<compile_context>
chip_gen: v5e
topology: v5e:2x2
jax: 0.10.0
libtpu: 0.0.40
codegen_flags: <defaults>
</compile_context>

<pallas_src>
import math
import jax
import jax.numpy as jnp
from jax import lax
from jax.experimental import pallas as pl
from jax.experimental.pallas import tpu as pltpu

# matches torch.nn.functional.rms_norm default eps (finfo(f32).eps)
EPS = float(jnp.finfo(jnp.float32).eps)

# ----------------------------- small config -----------------------------
VOCAB_SIZE = 512
N_LAYER = 2
N_HEAD = 4
N_EMBD = 64          # head_dim = 16
BATCH = 2
SEQ = 16


# ----------------------------- rotary (the spec module) -----------------------------
def rotary_forward(seq_len, dim, base=10000.0):
    """Mirrors Rotary.forward: bf16 cos/sin caches of shape (1, T, 1, dim//2)."""
    inv_freq = 1.0 / (base ** (jnp.arange(0, dim, 2, dtype=jnp.float32) / dim))
    t = jnp.arange(seq_len, dtype=jnp.float32)
    freqs = jnp.outer(t, inv_freq)
    cos = jnp.cos(freqs).astype(jnp.bfloat16)   # cos_cached
    sin = jnp.sin(freqs).astype(jnp.bfloat16)   # sin_cached
    return cos[None, :, None, :], sin[None, :, None, :]


def rope_half_tables(seq_len, head_dim):
    """Half-width (T, D//2) f32 tables derived from the (bf16) Rotary caches."""
    cos4, sin4 = rotary_forward(seq_len, head_dim)
    return (cos4[0, :, 0, :].astype(jnp.float32),
            sin4[0, :, 0, :].astype(jnp.float32))


# ----------------------------- constant-table builders (wrapper side) -----------------------------
def build_rope_slab_tables(T, n_head, head_dim, batch_block):
    """(bb*T, 2C) cos/sin tables for the packed [q1|k1|q2|k2] q/k slab.

    The attention scale 1/sqrt(D) is folded into the q lanes, and the rope sign
    pattern ([sin, -sin]) is folded into the sin table, so the in-kernel rope is
    just  out = qk * cos2 + roll(qk, C) * sin2  (one roll + 2 mul + 1 add)."""
    cos, sin = rope_half_tables(T, head_dim)              # (T, D/2) each
    scale = 1.0 / math.sqrt(head_dim)
    cos_r = jnp.tile(cos, (1, n_head))                    # (T, C/2)
    sin_r = jnp.tile(sin, (1, n_head))
    cos2 = jnp.concatenate([scale * cos_r, cos_r, scale * cos_r, cos_r], axis=-1)
    sin2 = jnp.concatenate([scale * sin_r, sin_r, -scale * sin_r, -sin_r], axis=-1)
    cos2 = jnp.tile(cos2, (batch_block, 1)).astype(jnp.float32)
    sin2 = jnp.tile(sin2, (batch_block, 1)).astype(jnp.float32)
    return cos2, sin2


def build_headnorm_matrix(n_embd, n_head):
    """(2C, 2C) f32 matrix M with M[i,j] = 1/D if lanes i,j belong to the same
    (q|k, head) group in the packed slab layout.  (qk*qk) @ M gives the per-head
    mean-of-squares already broadcast to every lane of that head (one MXU matmul
    instead of 2H narrow cross-lane reductions)."""
    C, H = n_embd, n_head
    D = C // H
    d = D // 2
    lane = jnp.arange(2 * C)
    region = lane // (C // 2)                 # 0:q-half0  1:k-half0  2:q-half1  3:k-half1
    head = (lane % (C // 2)) // d
    gid = head + H * (region % 2)             # q groups 0..H-1, k groups H..2H-1
    return (gid[:, None] == gid[None, :]).astype(jnp.float32) / D


def qkv_column_permutation(n_embd, n_head):
    """Column permutation putting the fused QKV weight into
    [q first-halves | k first-halves | q second-halves | k second-halves | v]."""
    C, H = n_embd, n_head
    D = C // H
    d = D // 2
    cols = []
    for region in range(4):
        base = 0 if region % 2 == 0 else C    # q columns start at 0, k columns at C
        off = 0 if region < 2 else d          # first vs second half of each head
        for h in range(H):
            for j in range(d):
                cols.append(base + h * D + off + j)
    cols.extend(range(2 * C, 3 * C))          # v columns unchanged
    return jnp.asarray(cols, dtype=jnp.int32)


def build_causal_bias(batch_block, T):
    """(bb*T, bb*T) additive bias: 0 where (same batch element AND causal), else -inf."""
    i = jnp.arange(batch_block * T)
    ok = ((i[:, None] // T) == (i[None, :] // T)) & (i[:, None] >= i[None, :])
    return jnp.where(ok, 0.0, -jnp.inf).astype(jnp.float32)


def _default_batch_block(batch):
    """Batch rows folded into one block.  Single-TC v5e/v6e: whole batch (weights
    streamed once, fewer grid steps).  v7x has 2 TensorCores: keep >=2 parallel blocks."""
    try:
        kind = jax.devices()[0].device_kind.lower()
    except Exception:
        kind = ""
    if "v7" in kind and batch >= 2 and batch % 2 == 0:
        return batch // 2
    return batch


# ----------------------------- fused transformer-block kernel -----------------------------
def _make_block_kernel(n_head):
    def kernel(x_ref, wqkv_ref, wo_ref, wfc_ref, wproj_ref,
               cos_ref, sin_ref, bias_ref, norm_ref, o_ref):
        l = pl.program_id(1)

        # Layer 0: initialize the resident activation block from the embeddings
        # (the embedding array is aliased to this output, so no extra HBM buffer).
        @pl.when(l == 0)
        def _():
            o_ref[...] = x_ref[...]

        x = o_ref[...]                        # (BT, C) f32, resident across the layer axis
        wqkv = wqkv_ref[0]                    # (C, 3C) bf16 (q/k columns pre-permuted)
        wo = wo_ref[0]                        # (C, C)  bf16
        wfc = wfc_ref[0]                      # (C, 4C) bf16
        wproj = wproj_ref[0]                  # (4C, C) bf16
        cos2 = cos_ref[...]                   # (BT, 2C) f32, q lanes pre-scaled by 1/sqrt(D)
        sin2 = sin_ref[...]                   # (BT, 2C) f32, signed, q lanes pre-scaled
        bias = bias_ref[...]                  # (BT, BT) f32 additive causal/block-diag mask
        norm_mat = norm_ref[...]              # (2C, 2C) f32 per-head mean-of-squares matrix

        BT, C = x.shape
        H = n_head
        D = C // H
        d = D // 2
        half = C // 2                         # width of each q1/k1/q2/k2 region

        def rms(v):                           # elementwise math stays f32 (no bf16 VPU on v5e)
            return v * lax.rsqrt(jnp.mean(v * v, axis=-1, keepdims=True) + EPS)

        # ---- attention sub-block (rmsnorm fused into the QKV matmul) ----
        xn = rms(x).astype(jnp.bfloat16)
        qkv = jnp.dot(xn, wqkv, preferred_element_type=jnp.float32)    # (BT, 3C)

        qk = qkv[:, :2 * C]                   # (BT, 2C) packed [q1 | k1 | q2 | k2], lane-dense
        v_all = qkv[:, 2 * C:]                # (BT, C), original per-head order

        # per-head q/k rms-norm: mean-of-squares via one (f32) MXU matmul, no narrow reduces
        meansq = jnp.dot(qk * qk, norm_mat, preferred_element_type=jnp.float32)
        qk_n = qk * lax.rsqrt(meansq + EPS)

        # rotary: the half-swap of every head's q/k is a single full-width lane rotation
        qk_rot = pltpu.roll(qk_n, shift=C, axis=1)
        qk_rope = (qk_n * cos2 + qk_rot * sin2).astype(jnp.bfloat16)

        attn = jnp.zeros((BT, C), jnp.float32)
        for h in range(H):                    # static unroll over heads
            q1 = qk_rope[:, h * d:(h + 1) * d]
            k1 = qk_rope[:, half + h * d:half + (h + 1) * d]
            q2 = qk_rope[:, 2 * half + h * d:2 * half + (h + 1) * d]
            k2 = qk_rope[:, 3 * half + h * d:3 * half + (h + 1) * d]
            # q.k split over the two rope halves (same sum, no concat / relayout)
            s = (jnp.einsum("td,sd->ts", q1, k1, preferred_element_type=jnp.float32)
                 + jnp.einsum("td,sd->ts", q2, k2, preferred_element_type=jnp.float32)
                 + bias)
            m = jnp.max(s, axis=-1, keepdims=True)
            p = jnp.exp(s - m)
            # softmax normalization on the EUP approximate-reciprocal slot (forward only)
            p = p * pl.reciprocal(jnp.sum(p, axis=-1, keepdims=True), approx=True)
            vh = v_all[:, h * D:(h + 1) * D].astype(jnp.bfloat16)
            pv = jnp.dot(p.astype(jnp.bfloat16), vh, preferred_element_type=jnp.float32)
            # fold the output projection into the head loop: no heads-concat relayout,
            # every MXU output stays lane-dense at width C
            attn = attn + jnp.dot(pv.astype(jnp.bfloat16), wo[h * D:(h + 1) * D, :],
                                  preferred_element_type=jnp.float32)
        x = x + attn

        # ---- MLP sub-block (rmsnorm + relu^2 fused around the matmuls) ----
        xn = rms(x).astype(jnp.bfloat16)
        hdn = jnp.dot(xn, wfc, preferred_element_type=jnp.float32)
        hdn = jnp.maximum(hdn, 0.0)
        hdn = (hdn * hdn).astype(jnp.bfloat16)
        x = x + jnp.dot(hdn, wproj, preferred_element_type=jnp.float32)

        o_ref[...] = x
    return kernel


def transformer_layers(x2d, wqkv, wo, wfc, wproj, cos2, sin2, bias, norm_mat,
                       n_head, block_rows):
    """One pallas_call for all layers: grid=(batch_blocks, layer), activations resident."""
    BT, C = x2d.shape
    L = wqkv.shape[0]
    nb = BT // block_rows

    act_spec = pl.BlockSpec((block_rows, C), lambda b, l: (b, 0))

    def const2d(arr):        # constant index_map -> DMA'd once, stays resident in VMEM
        return pl.BlockSpec(arr.shape, lambda b, l: (0, 0))

    def wspec(arr):
        return pl.BlockSpec((1,) + arr.shape[1:], lambda b, l: (l, 0, 0))

    # TODO(synk): at real GPT-2 sizes add K/N tiling for wfc/wproj and an explicit
    # vmem_limit_bytes sized for v7x's 64 MiB VMEM; at these toy shapes one slab/layer fits.
    return pl.pallas_call(
        _make_block_kernel(n_head),
        out_shape=jax.ShapeDtypeStruct((BT, C), jnp.float32),
        grid=(nb, L),
        in_specs=[act_spec, wspec(wqkv), wspec(wo), wspec(wfc), wspec(wproj),
                  const2d(cos2), const2d(sin2), const2d(bias), const2d(norm_mat)],
        out_specs=act_spec,
        input_output_aliases={0: 0},          # embeddings buffer == activation buffer (P8)
        compiler_params=pltpu.CompilerParams(
            dimension_semantics=("parallel", "arbitrary")),
    )(x2d, wqkv, wo, wfc, wproj, cos2, sin2, bias, norm_mat)


# ----------------------------- lm_head kernel (rmsnorm fused, vocab-tiled) -----------------------------
def _lm_head_kernel(x_ref, w_ref, o_ref):
    x = x_ref[...]
    xn = (x * lax.rsqrt(jnp.mean(x * x, axis=-1, keepdims=True) + EPS)
          ).astype(jnp.bfloat16)
    o_ref[...] = jnp.dot(xn, w_ref[...], preferred_element_type=jnp.float32)


def lm_head(x2d, w_bf16, n_tile=256):
    """Vocab-tiled final projection: lane-dense 128-multiple output tiles; the x block
    is constant across vocab tiles so it is DMA'd once (the tiny rms recompute per
    tile is free relative to the matmul at real vocab sizes)."""
    M, C = x2d.shape
    V = w_bf16.shape[1]
    n_tile = min(n_tile, V)
    return pl.pallas_call(
        _lm_head_kernel,
        out_shape=jax.ShapeDtypeStruct((M, V), jnp.float32),
        grid=(pl.cdiv(V, n_tile),),
        in_specs=[pl.BlockSpec((M, C), lambda j: (0, 0)),
                  pl.BlockSpec((C, n_tile), lambda j: (0, j))],
        out_specs=pl.BlockSpec((M, n_tile), lambda j: (0, j)),
        compiler_params=pltpu.CompilerParams(dimension_semantics=("parallel",)),
    )(x2d, w_bf16)


# ----------------------------- model glue -----------------------------
def init_params(key, vocab, n_layer, n_embd):
    keys = jax.random.split(key, 1 + 6 * n_layer)
    wte = 0.02 * jax.random.normal(keys[0], (vocab, n_embd), jnp.float32)
    wqkv, wo, wfc, wproj = [], [], [], []
    for i in range(n_layer):
        k = keys[1 + 6 * i: 1 + 6 * (i + 1)]
        wq = 0.02 * jax.random.normal(k[0], (n_embd, n_embd), jnp.float32)
        wk = 0.02 * jax.random.normal(k[1], (n_embd, n_embd), jnp.float32)
        wv = 0.02 * jax.random.normal(k[2], (n_embd, n_embd), jnp.float32)
        wqkv.append(jnp.concatenate([wq, wk, wv], axis=1))           # fused QKV
        wo.append(0.02 * jax.random.normal(k[3], (n_embd, n_embd), jnp.float32))
        wfc.append(0.02 * jax.random.normal(k[4], (n_embd, 4 * n_embd), jnp.float32))
        wproj.append(0.02 * jax.random.normal(k[5], (4 * n_embd, n_embd), jnp.float32))
    stack_bf16 = lambda xs: jnp.stack(xs).astype(jnp.bfloat16)       # bf16 MXU operands
    return dict(wte=wte,
                wqkv=stack_bf16(wqkv), wo=stack_bf16(wo),
                wfc=stack_bf16(wfc), wproj=stack_bf16(wproj),
                lm_head=wte.T.astype(jnp.bfloat16))                  # tied lm_head


def gpt_forward(idx, params, n_head):
    wte = params["wte"]
    B, T = idx.shape
    C = wte.shape[1]
    D = C // n_head
    # TODO(synk): token-embedding gather stays in XLA (jnp.take); the data-dependent
    # row gather has no clean BlockSpec form at this size.
    x = jnp.take(wte, idx, axis=0).reshape(B * T, C)

    bb = _default_batch_block(B)
    block_rows = bb * T
    cos2, sin2 = build_rope_slab_tables(T, n_head, D, bb)
    bias = build_causal_bias(bb, T)
    norm_mat = build_headnorm_matrix(C, n_head)
    perm = qkv_column_permutation(C, n_head)
    wqkv_packed = jnp.take(params["wqkv"], perm, axis=2)             # one-time, outside kernel

    x = transformer_layers(x, wqkv_packed, params["wo"], params["wfc"],
                           params["wproj"], cos2, sin2, bias, norm_mat,
                           n_head, block_rows)
    logits = lm_head(x, params["lm_head"])
    return logits.reshape(B, T, -1)


# ----------------------------- pure-JAX reference -----------------------------
def gpt_reference(idx, params, n_head):
    """Straightforward reference (original QKV layout, concat-style rope), mirroring the
    bf16 MXU operands with f32 accumulation."""
    wte = params["wte"]
    B, T = idx.shape
    C = wte.shape[1]
    H = n_head
    D = C // H
    d = D // 2
    x = jnp.take(wte, idx, axis=0)
    cos, sin = rope_half_tables(T, D)

    def rms(v):
        return v * lax.rsqrt(jnp.mean(v * v, axis=-1, keepdims=True) + EPS)

    def bdot(a, b):
        return jnp.dot(a.astype(jnp.bfloat16), b.astype(jnp.bfloat16),
                       preferred_element_type=jnp.float32)

    def rope(v):  # v: (B, H, T, D)
        v1, v2 = v[..., :d], v[..., d:]
        return jnp.concatenate([v1 * cos + v2 * sin, -v1 * sin + v2 * cos], -1)

    L = params["wqkv"].shape[0]
    for l in range(L):
        xn = rms(x)
        qkv = bdot(xn, params["wqkv"][l])                    # (B, T, 3C)
        split = lambda t: t.reshape(B, T, H, D).transpose(0, 2, 1, 3)
        q, k, v = (split(qkv[..., :C]), split(qkv[..., C:2 * C]),
                   split(qkv[..., 2 * C:]))
        q, k = rope(rms(q)), rope(rms(k))
        s = jnp.einsum("bhtd,bhsd->bhts", q.astype(jnp.bfloat16),
                       k.astype(jnp.bfloat16),
                       preferred_element_type=jnp.float32) / math.sqrt(D)
        mask = jnp.tril(jnp.ones((T, T), bool))
        s = jnp.where(mask, s, -jnp.inf)
        p = jax.nn.softmax(s, axis=-1)
        y = jnp.einsum("bhts,bhsd->bhtd", p.astype(jnp.bfloat16),
                       v.astype(jnp.bfloat16),
                       preferred_element_type=jnp.float32)
        y = y.transpose(0, 2, 1, 3).reshape(B, T, C)
        x = x + bdot(y, params["wo"][l])
        h = jnp.square(jax.nn.relu(bdot(rms(x), params["wfc"][l])))
        x = x + bdot(h, params["wproj"][l])
    return bdot(rms(x), params["lm_head"]).astype(jnp.float32)


# ----------------------------- main -----------------------------
if __name__ == "__main__":
    key = jax.random.PRNGKey(0)
    pkey, ikey = jax.random.split(key)
    params = init_params(pkey, VOCAB_SIZE, N_LAYER, N_EMBD)
    idx = jax.random.randint(ikey, (BATCH, SEQ), 0, VOCAB_SIZE, dtype=jnp.int32)

    # spec-module sanity check: Rotary.forward cache shapes / dtypes
    head_dim = N_EMBD // N_HEAD
    cos_c, sin_c = rotary_forward(SEQ, head_dim)
    assert cos_c.shape == (1, SEQ, 1, head_dim // 2)
    assert sin_c.shape == (1, SEQ, 1, head_dim // 2)
    assert cos_c.dtype == jnp.bfloat16 and sin_c.dtype == jnp.bfloat16

    fwd = jax.jit(lambda tok, p: gpt_forward(tok, p, N_HEAD))
    logits = jax.block_until_ready(fwd(idx, params))

    assert logits.shape == (BATCH, SEQ, VOCAB_SIZE)
    assert logits.dtype == jnp.float32
    assert bool(jnp.all(jnp.isfinite(logits)))

    ref = jax.block_until_ready(gpt_reference(idx, params, N_HEAD))
    # bf16 MXU operands are mirrored in the reference; remaining deltas come from the EUP
    # approximate reciprocal in the softmax and reduction-order / packing differences.
    assert bool(jnp.allclose(logits, ref, atol=5e-3, rtol=5e-3)), \
        "Pallas output mismatch vs reference"

    print("KERNEL_OK")
</pallas_src>

<mosaic_0001>
module attributes {stable_mosaic.version = 11 : i64} {
  func.func @_lm_head_kernel(%arg0: i32, %arg1: memref<32x64xf32, #tpu.memory_space<vmem>>, %arg2: memref<64x256xbf16, #tpu.memory_space<vmem>>, %arg3: memref<32x256xf32, #tpu.memory_space<vmem>>) attributes {dimension_semantics = [#tpu.dimension_semantics<parallel>], iteration_bounds = array<i64: 2>, scalar_prefetch = 0 : i64, scratch_operands = 0 : i64, tpu.core_type = #tpu.core_type<tc>, window_params = [{pipeline_mode = #tpu.pipeline_mode<synchronous>, transform_indices = @transform_0, window_bounds = array<i64: 32, 64>}, {transform_indices = @transform_1, window_bounds = array<i64: 64, 256>}, {transform_indices = @transform_2, window_bounds = array<i64: 32, 256>}]} {
    %c0 = arith.constant 0 : index
    %c0_0 = arith.constant 0 : index
    %0 = vector.load %arg1[%c0, %c0_0] : memref<32x64xf32, #tpu.memory_space<vmem>>, vector<32x64xf32>
    %1 = arith.mulf %0, %0 : vector<32x64xf32>
    %cst = arith.constant dense<0.000000e+00> : vector<32xf32>
    %2 = vector.multi_reduction <add>, %1, %cst [1] : vector<32x64xf32> to vector<32xf32>
    %3 = vector.shape_cast %2 : vector<32xf32> to vector<32x1xf32>
    %cst_1 = arith.constant 6.400000e+01 : f32
    %4 = vector.broadcast %cst_1 : f32 to vector<32x1xf32>
    %5 = arith.divf %3, %4 : vector<32x1xf32>
    %cst_2 = arith.constant 1.1920929E-7 : f32
    %6 = vector.broadcast %cst_2 : f32 to vector<32x1xf32>
    %7 = arith.addf %5, %6 : vector<32x1xf32>
    %8 = math.rsqrt %7 : vector<32x1xf32>
    %9 = vector.broadcast %8 : vector<32x1xf32> to vector<32x64xf32>
    %10 = arith.mulf %0, %9 : vector<32x64xf32>
    %11 = arith.truncf %10 : vector<32x64xf32> to vector<32x64xbf16>
    %c0_3 = arith.constant 0 : index
    %c0_4 = arith.constant 0 : index
    %12 = vector.load %arg2[%c0_3, %c0_4] : memref<64x256xbf16, #tpu.memory_space<vmem>>, vector<64x256xbf16>
    %cst_5 = arith.constant dense<0.000000e+00> : vector<32x256xf32>
    %13 = tpu.matmul %11, %12, %cst_5 {dimension_numbers = #tpu.dot_dimension_numbers<[1], [0], [0], [1], [0, 0, 1, 1], [], []>} : vector<32x64xbf16>, vector<64x256xbf16>, vector<32x256xf32> -> vector<32x256xf32>
    %c0_6 = arith.constant 0 : index
    %c0_7 = arith.constant 0 : index
    %14 = vector.load %arg3[%c0_6, %c0_7] : memref<32x256xf32, #tpu.memory_space<vmem>>, vector<32x256xf32>
    tpu.vector_store %arg3[%c0_6, %c0_7], %13 {strides = array<i32>} : memref<32x256xf32, #tpu.memory_space<vmem>>, vector<32x256xf32>,
    return
  }
  func.func @transform_0(%arg0: i32) -> (i32, i32) {
    %c0_i32 = arith.constant 0 : i32
    %c0_i32_0 = arith.constant 0 : i32
    %c0_i32_1 = arith.constant 0 : i32
    return %c0_i32, %c0_i32_0 : i32, i32
  }
  func.func @transform_1(%arg0: i32) -> (i32, i32) {
    %c0_i32 = arith.constant 0 : i32
    %c0_i32_0 = arith.constant 0 : i32
    return %c0_i32, %arg0 : i32, i32
  }
  func.func @transform_2(%arg0: i32) -> (i32, i32) {
    %c0_i32 = arith.constant 0 : i32
    %c0_i32_0 = arith.constant 0 : i32
    return %c0_i32, %arg0 : i32, i32
  }
}

module attributes {stable_mosaic.version = 11 : i64} {
  func.func @kernel(%arg0: i32, %arg1: i32, %arg2: memref<32x64xf32, #tpu.memory_space<vmem>>, %arg3: memref<1x64x192xbf16, #tpu.memory_space<vmem>>, %arg4: memref<1x64x64xbf16, #tpu.memory_space<vmem>>, %arg5: memref<1x64x256xbf16, #tpu.memory_space<vmem>>, %arg6: memref<1x256x64xbf16, #tpu.memory_space<vmem>>, %arg7: memref<32x128xf32, #tpu.memory_space<vmem>>, %arg8: memref<32x128xf32, #tpu.memory_space<vmem>>, %arg9: memref<32x32xf32, #tpu.memory_space<vmem>>, %arg10: memref<128x128xf32, #tpu.memory_space<vmem>>, %arg11: memref<32x64xf32, #tpu.memory_space<vmem>>) attributes {dimension_semantics = [#tpu.dimension_semantics<parallel>, #tpu.dimension_semantics<arbitrary>], iteration_bounds = array<i64: 1, 2>, scalar_prefetch = 0 : i64, scratch_operands = 0 : i64, tpu.core_type = #tpu.core_type<tc>, window_params = [{transform_indices = @transform_0, window_bounds = array<i64: 32, 64>}, {transform_indices = @transform_1, window_bounds = array<i64: 1, 64, 192>}, {transform_indices = @transform_2, window_bounds = array<i64: 1, 64, 64>}, {transform_indices = @transform_3, window_bounds = array<i64: 1, 64, 256>}, {transform_indices = @transform_4, window_bounds = array<i64: 1, 256, 64>}, {pipeline_mode = #tpu.pipeline_mode<synchronous>, transform_indices = @transform_5, window_bounds = array<i64: 32, 128>}, {pipeline_mode = #tpu.pipeline_mode<synchronous>, transform_indices = @transform_6, window_bounds = array<i64: 32, 128>}, {pipeline_mode = #tpu.pipeline_mode<synchronous>, transform_indices = @transform_7, window_bounds = array<i64: 32, 32>}, {pipeline_mode = #tpu.pipeline_mode<synchronous>, transform_indices = @transform_8, window_bounds = array<i64: 128, 128>}, {transform_indices = @transform_9, window_bounds = array<i64: 32, 64>}]} {
    %c0_i32 = arith.constant 0 : i32
    %0 = arith.cmpi eq, %arg1, %c0_i32 : i32
    %1 = arith.extui %0 : i1 to i32
    %c0_i32_0 = arith.constant 0 : i32
    %2 = arith.cmpi ne, %1, %c0_i32_0 : i32
    scf.if %2 {
      %c0_60 = arith.constant 0 : index
      %c0_61 = arith.constant 0 : index
      %166 = vector.load %arg2[%c0_60, %c0_61] : memref<32x64xf32, #tpu.memory_space<vmem>>, vector<32x64xf32>
      %c0_62 = arith.constant 0 : index
      %c0_63 = arith.constant 0 : index
      %167 = vector.load %arg11[%c0_62, %c0_63] : memref<32x64xf32, #tpu.memory_space<vmem>>, vector<32x64xf32>
      tpu.vector_store %arg11[%c0_62, %c0_63], %166 {strides = array<i32>} : memref<32x64xf32, #tpu.memory_space<vmem>>, vector<32x64xf32>,
    } else {
    }
    %c0 = arith.constant 0 : index
    %c0_1 = arith.constant 0 : index
    %3 = vector.load %arg11[%c0, %c0_1] : memref<32x64xf32, #tpu.memory_space<vmem>>, vector<32x64xf32>
    %c0_2 = arith.constant 0 : index
    %c0_3 = arith.constant 0 : index
    %c0_4 = arith.constant 0 : index
    %4 = vector.load %arg3[%c0_2, %c0_3, %c0_4] : memref<1x64x192xbf16, #tpu.memory_space<vmem>>, vector<1x64x192xbf16>
    %5 = vector.shape_cast %4 : vector<1x64x192xbf16> to vector<64x192xbf16>
    %c0_5 = arith.constant 0 : index
    %c0_6 = arith.constant 0 : index
    %c0_7 = arith.constant 0 : index
    %6 = vector.load %arg4[%c0_5, %c0_6, %c0_7] : memref<1x64x64xbf16, #tpu.memory_space<vmem>>, vector<1x64x64xbf16>
    %7 = vector.shape_cast %6 : vector<1x64x64xbf16> to vector<64x64xbf16>
    %c0_8 = arith.constant 0 : index
    %c0_9 = arith.constant 0 : index
    %c0_10 = arith.constant 0 : index
    %8 = vector.load %arg5[%c0_8, %c0_9, %c0_10] : memref<1x64x256xbf16, #tpu.memory_space<vmem>>, vector<1x64x256xbf16>
    %9 = vector.shape_cast %8 : vector<1x64x256xbf16> to vector<64x256xbf16>
    %c0_11 = arith.constant 0 : index
    %c0_12 = arith.constant 0 : index
    %c0_13 = arith.constant 0 : index
    %10 = vector.load %arg6[%c0_11, %c0_12, %c0_13] : memref<1x256x64xbf16, #tpu.memory_space<vmem>>, vector<1x256x64xbf16>
    %11 = vector.shape_cast %10 : vector<1x256x64xbf16> to vector<256x64xbf16>
    %c0_14 = arith.constant 0 : index
    %c0_15 = arith.constant 0 : index
    %12 = vector.load %arg7[%c0_14, %c0_15] : memref<32x128xf32, #tpu.memory_space<vmem>>, vector<32x128xf32>
    %c0_16 = arith.constant 0 : index
    %c0_17 = arith.constant 0 : index
    %13 = vector.load %arg8[%c0_16, %c0_17] : memref<32x128xf32, #tpu.memory_space<vmem>>, vector<32x128xf32>
    %c0_18 = arith.constant 0 : index
    %c0_19 = arith.constant 0 : index
    %14 = vector.load %arg9[%c0_18, %c0_19] : memref<32x32xf32, #tpu.memory_space<vmem>>, vector<32x32xf32>
    %c0_20 = arith.constant 0 : index
    %c0_21 = arith.constant 0 : index
    %15 = vector.load %arg10[%c0_20, %c0_21] : memref<128x128xf32, #tpu.memory_space<vmem>>, vector<128x128xf32>
    %16 = arith.mulf %3, %3 : vector<32x64xf32>
    %cst = arith.constant dense<0.000000e+00> : vector<32xf32>
    %17 = vector.multi_reduction <add>, %16, %cst [1] : vector<32x64xf32> to vector<32xf32>
    %18 = vector.shape_cast %17 : vector<32xf32> to vector<32x1xf32>
    %cst_22 = arith.constant 6.400000e+01 : f32
    %19 = vector.broadcast %cst_22 : f32 to vector<32x1xf32>
    %20 = arith.divf %18, %19 : vector<32x1xf32>
    %cst_23 = arith.constant 1.1920929E-7 : f32
    %21 = vector.broadcast %cst_23 : f32 to vector<32x1xf32>
    %22 = arith.addf %20, %21 : vector<32x1xf32>
    %23 = math.rsqrt %22 : vector<32x1xf32>
    %24 = vector.broadcast %23 : vector<32x1xf32> to vector<32x64xf32>
    %25 = arith.mulf %3, %24 : vector<32x64xf32>
    %26 = arith.truncf %25 : vector<32x64xf32> to vector<32x64xbf16>
    %cst_24 = arith.constant dense<0.000000e+00> : vector<32x192xf32>
    %27 = tpu.matmul %26, %5, %cst_24 {dimension_numbers = #tpu.dot_dimension_numbers<[1], [0], [0], [1], [0, 0, 1, 1], [], []>} : vector<32x64xbf16>, vector<64x192xbf16>, vector<32x192xf32> -> vector<32x192xf32>
    %28 = vector.extract_strided_slice %27 {offsets = [0, 0], sizes = [32, 128], strides = [1, 1]} : vector<32x192xf32> to vector<32x128xf32>
    %29 = vector.extract_strided_slice %27 {offsets = [0, 128], sizes = [32, 64], strides = [1, 1]} : vector<32x192xf32> to vector<32x64xf32>
    %30 = arith.mulf %28, %28 : vector<32x128xf32>
    %cst_25 = arith.constant dense<0.000000e+00> : vector<32x128xf32>
    %31 = tpu.matmul %30, %15, %cst_25 {dimension_numbers = #tpu.dot_dimension_numbers<[1], [0], [0], [1], [0, 0, 1, 1], [], []>} : vector<32x128xf32>, vector<128x128xf32>, vector<32x128xf32> -> vector<32x128xf32>
    %cst_26 = arith.constant 1.1920929E-7 : f32
    %32 = vector.broadcast %cst_26 : f32 to vector<32x128xf32>
    %33 = arith.addf %31, %32 : vector<32x128xf32>
    %34 = math.rsqrt %33 : vector<32x128xf32>
    %35 = arith.mulf %28, %34 : vector<32x128xf32>
    %c64_i32 = arith.constant 64 : i32
    %36 = tpu.dynamic_rotate %35 by %c64_i32 dim 1 : vector<32x128xf32>, i32 -> vector<32x128xf32>
    %37 = arith.mulf %35, %12 : vector<32x128xf32>
    %38 = arith.mulf %36, %13 : vector<32x128xf32>
    %39 = arith.addf %37, %38 : vector<32x128xf32>
    %40 = arith.truncf %39 : vector<32x128xf32> to vector<32x128xbf16>
    %cst_27 = arith.constant 0.000000e+00 : f32
    %41 = vector.broadcast %cst_27 : f32 to vector<32x64xf32>
    %42 = vector.extract_strided_slice %40 {offsets = [0, 0], sizes = [32, 8], strides = [1, 1]} : vector<32x128xbf16> to vector<32x8xbf16>
    %43 = vector.extract_strided_slice %40 {offsets = [0, 32], sizes = [32, 8], strides = [1, 1]} : vector<32x128xbf16> to vector<32x8xbf16>
    %44 = vector.extract_strided_slice %40 {offsets = [0, 64], sizes = [32, 8], strides = [1, 1]} : vector<32x128xbf16> to vector<32x8xbf16>
    %45 = vector.extract_strided_slice %40 {offsets = [0, 96], sizes = [32, 8], strides = [1, 1]} : vector<32x128xbf16> to vector<32x8xbf16>
    "tpu.trace_start"() <{level = 10 : i32, message = "td,sd->ts"}> : () -> ()
    %cst_28 = arith.constant dense<0.000000e+00> : vector<32x32xf32>
    %46 = tpu.matmul %42, %43, %cst_28 {dimension_numbers = #tpu.dot_dimension_numbers<[1], [1], [0], [0], [0, 0, 1, 0], [], []>} : vector<32x8xbf16>, vector<32x8xbf16>, vector<32x32xf32> -> vector<32x32xf32>
    %cst_29 = arith.constant dense<0.000000e+00> : vector<32x32xf32>
    %47 = tpu.matmul %44, %45, %cst_29 {dimension_numbers = #tpu.dot_dimension_numbers<[1], [1], [0], [0], [0, 0, 1, 0], [], []>} : vector<32x8xbf16>, vector<32x8xbf16>, vector<32x32xf32> -> vector<32x32xf32>
    "tpu.trace_stop"() : () -> ()
    %48 = arith.addf %46, %47 : vector<32x32xf32>
    %49 = arith.addf %48, %14 : vector<32x32xf32>
    %cst_30 = arith.constant dense<0xFF800000> : vector<32xf32>
    %50 = vector.multi_reduction <maximumf>, %49, %cst_30 [1] : vector<32x32xf32> to vector<32xf32>
    %51 = vector.shape_cast %50 : vector<32xf32> to vector<32x1xf32>
    %52 = vector.broadcast %51 : vector<32x1xf32> to vector<32x32xf32>
    %53 = arith.subf %49, %52 : vector<32x32xf32>
    %54 = math.exp %53 : vector<32x32xf32>
    %cst_31 = arith.constant dense<0.000000e+00> : vector<32xf32>
    %55 = vector.multi_reduction <add>, %54, %cst_31 [1] : vector<32x32xf32> to vector<32xf32>
    %56 = vector.shape_cast %55 : vector<32xf32> to vector<32x1xf32>
    %57 = tpu.reciprocal %56 {approx = true} : vector<32x1xf32> -> vector<32x1xf32>
    %58 = vector.broadcast %57 : vector<32x1xf32> to vector<32x32xf32>
    %59 = arith.mulf %54, %58 : vector<32x32xf32>
    %60 = vector.extract_strided_slice %29 {offsets = [0, 0], sizes = [32, 16], strides = [1, 1]} : vector<32x64xf32> to vector<32x16xf32>
    %61 = arith.truncf %60 : vector<32x16xf32> to vector<32x16xbf16>
    %62 = arith.truncf %59 : vector<32x32xf32> to vector<32x32xbf16>
    %cst_32 = arith.constant dense<0.000000e+00> : vector<32x16xf32>
    %63 = tpu.matmul %62, %61, %cst_32 {dimension_numbers = #tpu.dot_dimension_numbers<[1], [0], [0], [1], [0, 0, 1, 1], [], []>} : vector<32x32xbf16>, vector<32x16xbf16>, vector<32x16xf32> -> vector<32x16xf32>
    %64 = arith.truncf %63 : vector<32x16xf32> to vector<32x16xbf16>
    %65 = vector.extract_strided_slice %7 {offsets = [0, 0], sizes = [16, 64], strides = [1, 1]} : vector<64x64xbf16> to vector<16x64xbf16>
    %cst_33 = arith.constant dense<0.000000e+00> : vector<32x64xf32>
    %66 = tpu.matmul %64, %65, %cst_33 {dimension_numbers = #tpu.dot_dimension_numbers<[1], [0], [0], [1], [0, 0, 1, 1], [], []>} : vector<32x16xbf16>, vector<16x64xbf16>, vector<32x64xf32> -> vector<32x64xf32>
    %67 = arith.addf %41, %66 : vector<32x64xf32>
    %68 = vector.extract_strided_slice %40 {offsets = [0, 8], sizes = [32, 8], strides = [1, 1]} : vector<32x128xbf16> to vector<32x8xbf16>
    %69 = vector.extract_strided_slice %40 {offsets = [0, 40], sizes = [32, 8], strides = [1, 1]} : vector<32x128xbf16> to vector<32x8xbf16>
    %70 = vector.extract_strided_slice %40 {offsets = [0, 72], sizes = [32, 8], strides = [1, 1]} : vector<32x128xbf16> to vector<32x8xbf16>
    %71 = vector.extract_strided_slice %40 {offsets = [0, 104], sizes = [32, 8], strides = [1, 1]} : vector<32x128xbf16> to vector<32x8xbf16>
    "tpu.trace_start"() <{level = 10 : i32, message = "td,sd->ts"}> : () -> ()
    %cst_34 = arith.constant dense<0.000000e+00> : vector<32x32xf32>
    %72 = tpu.matmul %68, %69, %cst_34 {dimension_numbers = #tpu.dot_dimension_numbers<[1], [1], [0], [0], [0, 0, 1, 0], [], []>} : vector<32x8xbf16>, vector<32x8xbf16>, vector<32x32xf32> -> vector<32x32xf32>
    %cst_35 = arith.constant dense<0.000000e+00> : vector<32x32xf32>
    %73 = tpu.matmul %70, %71, %cst_35 {dimension_numbers = #tpu.dot_dimension_numbers<[1], [1], [0], [0], [0, 0, 1, 0], [], []>} : vector<32x8xbf16>, vector<32x8xbf16>, vector<32x32xf32> -> vector<32x32xf32>
    "tpu.trace_stop"() : () -> ()
    %74 = arith.addf %72, %73 : vector<32x32xf32>
    %75 = arith.addf %74, %14 : vector<32x32xf32>
    %cst_36 = arith.constant dense<0xFF800000> : vector<32xf32>
    %76 = vector.multi_reduction <maximumf>, %75, %cst_36 [1] : vector<32x32xf32> to vector<32xf32>
    %77 = vector.shape_cast %76 : vector<32xf32> to vector<32x1xf32>
    %78 = vector.broadcast %77 : vector<32x1xf32> to vector<32x32xf32>
    %79 = arith.subf %75, %78 : vector<32x32xf32>
    %80 = math.exp %79 : vector<32x32xf32>
    %cst_37 = arith.constant dense<0.000000e+00> : vector<32xf32>
    %81 = vector.multi_reduction <add>, %80, %cst_37 [1] : vector<32x32xf32> to vector<32xf32>
    %82 = vector.shape_cast %81 : vector<32xf32> to vector<32x1xf32>
    %83 = tpu.reciprocal %82 {approx = true} : vector<32x1xf32> -> vector<32x1xf32>
    %84 = vector.broadcast %83 : vector<32x1xf32> to vector<32x32xf32>
    %85 = arith.mulf %80, %84 : vector<32x32xf32>
    %86 = vector.extract_strided_slice %29 {offsets = [0, 16], sizes = [32, 16], strides = [1, 1]} : vector<32x64xf32> to vector<32x16xf32>
    %87 = arith.truncf %86 : vector<32x16xf32> to vector<32x16xbf16>
    %88 = arith.truncf %85 : vector<32x32xf32> to vector<32x32xbf16>
    %cst_38 = arith.constant dense<0.000000e+00> : vector<32x16xf32>
    %89 = tpu.matmul %88, %87, %cst_38 {dimension_numbers = #tpu.dot_dimension_numbers<[1], [0], [0], [1], [0, 0, 1, 1], [], []>} : vector<32x32xbf16>, vector<32x16xbf16>, vector<32x16xf32> -> vector<32x16xf32>
    %90 = arith.truncf %89 : vector<32x16xf32> to vector<32x16xbf16>
    %91 = vector.extract_strided_slice %7 {offsets = [16, 0], sizes = [16, 64], strides = [1, 1]} : vector<64x64xbf16> to vector<16x64xbf16>
    %cst_39 = arith.constant dense<0.000000e+00> : vector<32x64xf32>
    %92 = tpu.matmul %90, %91, %cst_39 {dimension_numbers = #tpu.dot_dimension_numbers<[1], [0], [0], [1], [0, 0, 1, 1], [], []>} : vector<32x16xbf16>, vector<16x64xbf16>, vector<32x64xf32> -> vector<32x64xf32>
    %93 = arith.addf %67, %92 : vector<32x64xf32>
    %94 = vector.extract_strided_slice %40 {offsets = [0, 16], sizes = [32, 8], strides = [1, 1]} : vector<32x128xbf16> to vector<32x8xbf16>
    %95 = vector.extract_strided_slice %40 {offsets = [0, 48], sizes = [32, 8], strides = [1, 1]} : vector<32x128xbf16> to vector<32x8xbf16>
    %96 = vector.extract_strided_slice %40 {offsets = [0, 80], sizes = [32, 8], strides = [1, 1]} : vector<32x128xbf16> to vector<32x8xbf16>
    %97 = vector.extract_strided_slice %40 {offsets = [0, 112], sizes = [32, 8], strides = [1, 1]} : vector<32x128xbf16> to vector<32x8xbf16>
    "tpu.trace_start"() <{level = 10 : i32, message = "td,sd->ts"}> : () -> ()
    %cst_40 = arith.constant dense<0.000000e+00> : vector<32x32xf32>
    %98 = tpu.matmul %94, %95, %cst_40 {dimension_numbers = #tpu.dot_dimension_numbers<[1], [1], [0], [0], [0, 0, 1, 0], [], []>} : vector<32x8xbf16>, vector<32x8xbf16>, vector<32x32xf32> -> vector<32x32xf32>
    %cst_41 = arith.constant dense<0.000000e+00> : vector<32x32xf32>
    %99 = tpu.matmul %96, %97, %cst_41 {dimension_numbers = #tpu.dot_dimension_numbers<[1], [1], [0], [0], [0, 0, 1, 0], [], []>} : vector<32x8xbf16>, vector<32x8xbf16>, vector<32x32xf32> -> vector<32x32xf32>
    "tpu.trace_stop"() : () -> ()
    %100 = arith.addf %98, %99 : vector<32x32xf32>
    %101 = arith.addf %100, %14 : vector<32x32xf32>
    %cst_42 = arith.constant dense<0xFF800000> : vector<32xf32>
    %102 = vector.multi_reduction <maximumf>, %101, %cst_42 [1] : vector<32x32xf32> to vector<32xf32>
    %103 = vector.shape_cast %102 : vector<32xf32> to vector<32x1xf32>
    %104 = vector.broadcast %103 : vector<32x1xf32> to vector<32x32xf32>
    %105 = arith.subf %101, %104 : vector<32x32xf32>
    %106 = math.exp %105 : vector<32x32xf32>
    %cst_43 = arith.constant dense<0.000000e+00> : vector<32xf32>
    %107 = vector.multi_reduction <add>, %106, %cst_43 [1] : vector<32x32xf32> to vector<32xf32>
    %108 = vector.shape_cast %107 : vector<32xf32> to vector<32x1xf32>
    %109 = tpu.reciprocal %108 {approx = true} : vector<32x1xf32> -> vector<32x1xf32>
    %110 = vector.broadcast %109 : vector<32x1xf32> to vector<32x32xf32>
    %111 = arith.mulf %106, %110 : vector<32x32xf32>
    %112 = vector.extract_strided_slice %29 {offsets = [0, 32], sizes = [32, 16], strides = [1, 1]} : vector<32x64xf32> to vector<32x16xf32>
    %113 = arith.truncf %112 : vector<32x16xf32> to vector<32x16xbf16>
    %114 = arith.truncf %111 : vector<32x32xf32> to vector<32x32xbf16>
    %cst_44 = arith.constant dense<0.000000e+00> : vector<32x16xf32>
    %115 = tpu.matmul %114, %113, %cst_44 {dimension_numbers = #tpu.dot_dimension_numbers<[1], [0], [0], [1], [0, 0, 1, 1], [], []>} : vector<32x32xbf16>, vector<32x16xbf16>, vector<32x16xf32> -> vector<32x16xf32>
    %116 = arith.truncf %115 : vector<32x16xf32> to vector<32x16xbf16>
    %117 = vector.extract_strided_slice %7 {offsets = [32, 0], sizes = [16, 64], strides = [1, 1]} : vector<64x64xbf16> to vector<16x64xbf16>
    %cst_45 = arith.constant dense<0.000000e+00> : vector<32x64xf32>
    %118 = tpu.matmul %116, %117, %cst_45 {dimension_numbers = #tpu.dot_dimension_numbers<[1], [0], [0], [1], [0, 0, 1, 1], [], []>} : vector<32x16xbf16>, vector<16x64xbf16>, vector<32x64xf32> -> vector<32x64xf32>
    %119 = arith.addf %93, %118 : vector<32x64xf32>
    %120 = vector.extract_strided_slice %40 {offsets = [0, 24], sizes = [32, 8], strides = [1, 1]} : vector<32x128xbf16> to vector<32x8xbf16>
    %121 = vector.extract_strided_slice %40 {offsets = [0, 56], sizes = [32, 8], strides = [1, 1]} : vector<32x128xbf16> to vector<32x8xbf16>
    %122 = vector.extract_strided_slice %40 {offsets = [0, 88], sizes = [32, 8], strides = [1, 1]} : vector<32x128xbf16> to vector<32x8xbf16>
    %123 = vector.extract_strided_slice %40 {offsets = [0, 120], sizes = [32, 8], strides = [1, 1]} : vector<32x128xbf16> to vector<32x8xbf16>
    "tpu.trace_start"() <{level = 10 : i32, message = "td,sd->ts"}> : () -> ()
    %cst_46 = arith.constant dense<0.000000e+00> : vector<32x32xf32>
    %124 = tpu.matmul %120, %121, %cst_46 {dimension_numbers = #tpu.dot_dimension_numbers<[1], [1], [0], [0], [0, 0, 1, 0], [], []>} : vector<32x8xbf16>, vector<32x8xbf16>, vector<32x32xf32> -> vector<32x32xf32>
    %cst_47 = arith.constant dense<0.000000e+00> : vector<32x32xf32>
    %125 = tpu.matmul %122, %123, %cst_47 {dimension_numbers = #tpu.dot_dimension_numbers<[1], [1], [0], [0], [0, 0, 1, 0], [], []>} : vector<32x8xbf16>, vector<32x8xbf16>, vector<32x32xf32> -> vector<32x32xf32>
    "tpu.trace_stop"() : () -> ()
    %126 = arith.addf %124, %125 : vector<32x32xf32>
    %127 = arith.addf %126, %14 : vector<32x32xf32>
    %cst_48 = arith.constant dense<0xFF800000> : vector<32xf32>
    %128 = vector.multi_reduction <maximumf>, %127, %cst_48 [1] : vector<32x32xf32> to vector<32xf32>
    %129 = vector.shape_cast %128 : vector<32xf32> to vector<32x1xf32>
    %130 = vector.broadcast %129 : vector<32x1xf32> to vector<32x32xf32>
    %131 = arith.subf %127, %130 : vector<32x32xf32>
    %132 = math.exp %131 : vector<32x32xf32>
    %cst_49 = arith.constant dense<0.000000e+00> : vector<32xf32>
    %133 = vector.multi_reduction <add>, %132, %cst_49 [1] : vector<32x32xf32> to vector<32xf32>
    %134 = vector.shape_cast %133 : vector<32xf32> to vector<32x1xf32>
    %135 = tpu.reciprocal %134 {approx = true} : vector<32x1xf32> -> vector<32x1xf32>
    %136 = vector.broadcast %135 : vector<32x1xf32> to vector<32x32xf32>
    %137 = arith.mulf %132, %136 : vector<32x32xf32>
    %138 = vector.extract_strided_slice %29 {offsets = [0, 48], sizes = [32, 16], strides = [1, 1]} : vector<32x64xf32> to vector<32x16xf32>
    %139 = arith.truncf %138 : vector<32x16xf32> to vector<32x16xbf16>
    %140 = arith.truncf %137 : vector<32x32xf32> to vector<32x32xbf16>
    %cst_50 = arith.constant dense<0.000000e+00> : vector<32x16xf32>
    %141 = tpu.matmul %140, %139, %cst_50 {dimension_numbers = #tpu.dot_dimension_numbers<[1], [0], [0], [1], [0, 0, 1, 1], [], []>} : vector<32x32xbf16>, vector<32x16xbf16>, vector<32x16xf32> -> vector<32x16xf32>
    %142 = arith.truncf %141 : vector<32x16xf32> to vector<32x16xbf16>
    %143 = vector.extract_strided_slice %7 {offsets = [48, 0], sizes = [16, 64], strides = [1, 1]} : vector<64x64xbf16> to vector<16x64xbf16>
    %cst_51 = arith.constant dense<0.000000e+00> : vector<32x64xf32>
    %144 = tpu.matmul %142, %143, %cst_51 {dimension_numbers = #tpu.dot_dimension_numbers<[1], [0], [0], [1], [0, 0, 1, 1], [], []>} : vector<32x16xbf16>, vector<16x64xbf16>, vector<32x64xf32> -> vector<32x64xf32>
    %145 = arith.addf %119, %144 : vector<32x64xf32>
    %146 = arith.addf %3, %145 : vector<32x64xf32>
    %147 = arith.mulf %146, %146 : vector<32x64xf32>
    %cst_52 = arith.constant dense<0.000000e+00> : vector<32xf32>
    %148 = vector.multi_reduction <add>, %147, %cst_52 [1] : vector<32x64xf32> to vector<32xf32>
    %149 = vector.shape_cast %148 : vector<32xf32> to vector<32x1xf32>
    %cst_53 = arith.constant 6.400000e+01 : f32
    %150 = vector.broadcast %cst_53 : f32 to vector<32x1xf32>
    %151 = arith.divf %149, %150 : vector<32x1xf32>
    %cst_54 = arith.constant 1.1920929E-7 : f32
    %152 = vector.broadcast %cst_54 : f32 to vector<32x1xf32>
    %153 = arith.addf %151, %152 : vector<32x1xf32>
    %154 = math.rsqrt %153 : vector<32x1xf32>
    %155 = vector.broadcast %154 : vector<32x1xf32> to vector<32x64xf32>
    %156 = arith.mulf %146, %155 : vector<32x64xf32>
    %157 = arith.truncf %156 : vector<32x64xf32> to vector<32x64xbf16>
    %cst_55 = arith.constant dense<0.000000e+00> : vector<32x256xf32>
    %158 = tpu.matmul %157, %9, %cst_55 {dimension_numbers = #tpu.dot_dimension_numbers<[1], [0], [0], [1], [0, 0, 1, 1], [], []>} : vector<32x64xbf16>, vector<64x256xbf16>, vector<32x256xf32> -> vector<32x256xf32>
    %cst_56 = arith.constant 0.000000e+00 : f32
    %159 = vector.broadcast %cst_56 : f32 to vector<32x256xf32>
    %160 = arith.maximumf %158, %159 : vector<32x256xf32>
    %161 = arith.mulf %160, %160 : vector<32x256xf32>
    %162 = arith.truncf %161 : vector<32x256xf32> to vector<32x256xbf16>
    %cst_57 = arith.constant dense<0.000000e+00> : vector<32x64xf32>
    %163 = tpu.matmul %162, %11, %cst_57 {dimension_numbers = #tpu.dot_dimension_numbers<[1], [0], [0], [1], [0, 0, 1, 1], [], []>} : vector<32x256xbf16>, vector<256x64xbf16>, vector<32x64xf32> -> vector<32x64xf32>
    %164 = arith.addf %146, %163 : vector<32x64xf32>
    %c0_58 = arith.constant 0 : index
    %c0_59 = arith.constant 0 : index
    %165 = vector.load %arg11[%c0_58, %c0_59] : memref<32x64xf32, #tpu.memory_space<vmem>>, vector<32x64xf32>
    tpu.vector_store %arg11[%c0_58, %c0_59], %164 {strides = array<i32>} : memref<32x64xf32, #tpu.memory_space<vmem>>, vector<32x64xf32>,
    return
  }
  func.func @transform_0(%arg0: i32, %arg1: i32) -> (i32, i32) {
    %c0_i32 = arith.constant 0 : i32
    %c0_i32_0 = arith.constant 0 : i32
    return %arg0, %c0_i32 : i32, i32
  }
  func.func @transform_1(%arg0: i32, %arg1: i32) -> (i32, i32, i32) {
    %c0_i32 = arith.constant 0 : i32
    %c0_i32_0 = arith.constant 0 : i32
    %c0_i32_1 = arith.constant 0 : i32
    return %arg1, %c0_i32, %c0_i32_0 : i32, i32, i32
  }
  func.func @transform_2(%arg0: i32, %arg1: i32) -> (i32, i32, i32) {
    %c0_i32 = arith.constant 0 : i32
    %c0_i32_0 = arith.constant 0 : i32
    %c0_i32_1 = arith.constant 0 : i32
    return %arg1, %c0_i32, %c0_i32_0 : i32, i32, i32
  }
  func.func @transform_3(%arg0: i32, %arg1: i32) -> (i32, i32, i32) {
    %c0_i32 = arith.constant 0 : i32
    %c0_i32_0 = arith.constant 0 : i32
    %c0_i32_1 = arith.constant 0 : i32
    return %arg1, %c0_i32, %c0_i32_0 : i32, i32, i32
  }
  func.func @transform_4(%arg0: i32, %arg1: i32) -> (i32, i32, i32) {
    %c0_i32 = arith.constant 0 : i32
    %c0_i32_0 = arith.constant 0 : i32
    %c0_i32_1 = arith.constant 0 : i32
    return %arg1, %c0_i32, %c0_i32_0 : i32, i32, i32
  }
  func.func @transform_5(%arg0: i32, %arg1: i32) -> (i32, i32) {
    %c0_i32 = arith.constant 0 : i32
    %c0_i32_0 = arith.constant 0 : i32
    %c0_i32_1 = arith.constant 0 : i32
    return %c0_i32, %c0_i32_0 : i32, i32
  }
  func.func @transform_6(%arg0: i32, %arg1: i32) -> (i32, i32) {
    %c0_i32 = arith.constant 0 : i32
    %c0_i32_0 = arith.constant 0 : i32
    %c0_i32_1 = arith.constant 0 : i32
    return %c0_i32, %c0_i32_0 : i32, i32
  }
  func.func @transform_7(%arg0: i32, %arg1: i32) -> (i32, i32) {
    %c0_i32 = arith.constant 0 : i32
    %c0_i32_0 = arith.constant 0 : i32
    %c0_i32_1 = arith.constant 0 : i32
    return %c0_i32, %c0_i32_0 : i32, i32
  }
  func.func @transform_8(%arg0: i32, %arg1: i32) -> (i32, i32) {
    %c0_i32 = arith.constant 0 : i32
    %c0_i32_0 = arith.constant 0 : i32
    %c0_i32_1 = arith.constant 0 : i32
    return %c0_i32, %c0_i32_0 : i32, i32
  }
  func.func @transform_9(%arg0: i32, %arg1: i32) -> (i32, i32) {
    %c0_i32 = arith.constant 0 : i32
    %c0_i32_0 = arith.constant 0 : i32
    return %arg0, %c0_i32 : i32, i32
  }
}

</mosaic_0001>

<bundles_post_ra>
// kernel: _lambda_.3
= control target key start
LH: loop header
LB: loop body
LE: loop exit
PB: predicated region body
PF: predicated region fallthrough
CT: control target
= control target key end

     0   :  { %7 = vsyncpa [#allocation4], 0  ;;  %s838_s0 = inlined_call_operand.vmem [shape: f32[32,64], index: 0, kind: input, shape index: {}]   ;;  %s839_s1 = inlined_call_operand.vmem [shape: bf16[64,512], index: 1, kind: input, shape index: {}]   ;;  %s840_s2 = inlined_call_operand.hbm [shape: f32[32,512], index: 2, kind: output, shape index: {}]  }
   0x1   :  { %9 = vsyncpa [#allocation4 + $0x1], 0  ;;  %s679_s9 = smov 0   ;;  %s681_s10 = smov 0  }
   0x2   :  { %s683_s11 = smov 0   ;;  %s685_s12 = smov 0  }
   0x3 LB: > { %s474_s13 = sadd.s32 4294967295, %s658_s12   ;;  %s475_s14 = sadd.s32 4294967294, %s658_s12   ;;  %s658_s12 = sphi %s685_s12, %s846_s12   ;;  %s654_s11 = sphi %s683_s11, %s845_s11   ;;  %s650_s10 = sphi %s681_s10, %s844_s10   ;;  %s646_s9 = sphi %s679_s9, %s843_s9  }
   0x4   : > { %s702_s15 = sadd.s32 1, %s658_s12   ;;  %s43_s16 = sadd.s32 1, %s654_s11 }
   0x5   : > { %s40_s17 = ssub.s32 %s658_s12, %s702_s15  ;;  %p50_p0 = scmp.ne.s32.totalorder %s654_s11, %s650_s10 }
   0x6   : > { %p41_p1 = scmp.eq.s32.totalorder %s40_s17, 0  ;;  %p51_p2 = scmp.eq.s32.totalorder %s658_s12, 0 }
   0x7   : > { %p80_p3 = scmp.eq.s32.totalorder %s474_s13, 1  ;;  %p85_p4 = scmp.ne.s32.totalorder %s650_s10, %s646_s9 }
   0x8   : > { %s715_s18 = scalar_select %p41_p1, %s654_s11, %s43_s16  }
   0x9   : > { %p52_p5 = por %p51_p2, %p50_p0  ;;  %p717_p6 = por %p80_p3, %p50_p0 }
   0xa   : > { %p86_p7 = scmp.eq.s32.totalorder %s475_s14, 1  ;;  %p477_p9 = scmp.ge.s32.totalorder %s658_s12, 2 }
   0xc   : > { %p721_p8 = por %p86_p7, %p85_p4  ;;  %105 = sbr.rel (%p477_p9) target bundleno = 29 (0x1d), region = 20 }
  0x11   : > { %108 = sbr.rel (!%p52_p5) target bundleno = 29 (0x1d), region = 24  ;;  %s110_s21 = sand.u32 (%p52_p5), 1, %s654_s11  }
  0x12   : > { %s525_s22 = sshll.u32 (%p52_p5), %s658_s12, 3  ;;  %s478_s23 = sshll.u32 (%p52_p5), %s110_s21, 6 }
  0x13   : > { %s115_s26 = scalar_lea.vmem (%p52_p5), %s839_s1, %s525_s22  ;;  %s112_s27 = scalar_lea.vmem (%p52_p5), [#allocation2], %s478_s23 }
  0x14   : > { %v158_v0 = vld [vmem:[%s115_s26] sm:$0xff] (%p52_p5)  ;;  %v160_v1 = vld [vmem:[%s115_s26 + $0x10] sm:$0xff] (%p52_p5) }
  0x15   : > { %v162_v2 = vld [vmem:[%s115_s26 + $0x20] sm:$0xff] (%p52_p5)  ;;  %159 = vst [vmem:[%s112_s27] sm:$0xff] (%p52_p5), %v158_v0  ;;  %v164_v3 = vld [vmem:[%s115_s26 + $0x30] sm:$0xff] (%p52_p5) }
  0x16   : > { %161 = vst [vmem:[%s112_s27 + $0x8] sm:$0xff] %v160_v1  ;;  %v166_v4 = vld [vmem:[%s115_s26 + $0x40] sm:$0xff]  ;;  %v168_v5 = vld [vmem:[%s115_s26 + $0x50] sm:$0xff] }
  0x17   : > { %163 = vst [vmem:[%s112_s27 + $0x10] sm:$0xff] %v162_v2  ;;  %v170_v6 = vld [vmem:[%s115_s26 + $0x60] sm:$0xff]  ;;  %v172_v7 = vld [vmem:[%s115_s26 + $0x70] sm:$0xff] }
  0x18   : > { %165 = vst [vmem:[%s112_s27 + $0x18] sm:$0xff] %v164_v3 }
  0x19   : > { %167 = vst [vmem:[%s112_s27 + $0x20] sm:$0xff] %v166_v4 }
  0x1a   : > { %169 = vst [vmem:[%s112_s27 + $0x28] sm:$0xff] %v168_v5 }
  0x1b   : > { %171 = vst [vmem:[%s112_s27 + $0x30] sm:$0xff] %v170_v6 }
  0x1c   : > { %173 = vst [vmem:[%s112_s27 + $0x38] sm:$0xff] %v172_v7 }
  0x1d PF: > { %p481_p10 = scmp.ge.s32.totalorder %s658_s12, 1  ;;  %p178_p11 = scmp.lt.s32.totalorder %s658_s12, 3 }
  0x1f   : > { %p179_p12 = pnand %p481_p10, %p178_p11 }
  0x20   : > { %s185_s8 = sand.u32 (!%p179_p12), 1, %s650_s10   ;;  %s534_s21 = sshll.u32 (!%p179_p12), %s474_s13, 4 }
  0x21   : > { %182 = sbr.rel (%p179_p12) target bundleno = 338 (0x152), region = 62  ;;  %s770_s14 = sshll.u32 (!%p179_p12), %s185_s8, 6 }
  0x22   : > { %s773_s16 = scalar_lea.vmem (!%p179_p12), [#allocation2], %s770_s14  ;;  %s205_s17 = scalar_lea.vmem (!%p179_p12), [#allocation3], %s770_s14 }
  0x23   : > { %s403_s24 = scalar_lea.hbm (!%p179_p12), %s840_s2, %s534_s21  ;;  %s404_s25 = sshll.u32 (!%p179_p12), %s205_s17, 4  ;;  %s405_s25 = int_to_ptr.vmem [resolvable:$true] %s404_s25 }
  0x24   : > { %s805_s26 = sshll.u32 (!%p179_p12), %s403_s24, 4  ;;  %s392_s13 = scalar_lea.sflag (!%p179_p12), [#allocation4], %s185_s8  ;;  %s407_s26 = int_to_ptr.hbm [resolvable:$true] %s805_s26 }
  0x25   : > { %s610_s27 = sshra.s32 (!%p179_p12), %s407_s26, 4  ;;  %s616_s3 = scalar_lea.hbm (!%p179_p12), %s840_s2, 128  ;;  %s611_s27 = int_to_ptr.hbm [resolvable:$true] %s610_s27 }
  0x26   : > { %v738_v8 = vld [vmem:[%s838_s0 + $0x10] sm:$0xff]  ;;  %vm217_vm0 = vcmask 523264   ;;  %v743_v9 = vld [vmem:[%s838_s0] sm:$0xff]  ;;  %v752_v12 = vld [vmem:[%s838_s0 + $0x18] sm:$0xff]  ;;  %v660_v20 = vmov 64.0   ;;  %s612_s28 = scalar_lea.hbm %s611_s27, 64  ;;  %p617_p2 = scmp.lt.s32.totalorder %s611_s27, %s840_s2 }
  0x27   : > { %v215_v10 = vmul.f32 %v738_v8, %v738_v8  ;;  %v213_v11 = vmul.f32 %v743_v9, %v743_v9  ;;  %v757_v13 = vld [vmem:[%s838_s0 + $0x8] sm:$0xff]  ;;  %v216_v16 = vmul.f32 %v752_v12, %v752_v12  ;;  %586 = vrcp.f32 %v660_v20  ;;  %v510_v24 = vld [vmem:[%s773_s16 + $0x30] sm:$0xf]  ;;  %v533_v25 = vld [vmem:[%s773_s16 + $0x34] sm:$0xf0]  ;;  %p613_p13 = scmp.ne.s32.totalorder %s611_s27, %s612_s28  ;;  %p618_p3 = scmp.lt.s32.totalorder %s616_s3, %s612_s28 }
  0x28   : > { %v214_v17 = vmul.f32 %v757_v13, %v757_v13  ;;  %v532_v26 = vld [vmem:[%s773_s16 + $0x34] sm:$0xf]  ;;  %v511_v27 = vor.u32 %v533_v25, %v510_v24  ;;  %v512_v28 = vld [vmem:[%s773_s16 + $0x38] sm:$0xf0]  ;;  %v502_v31 = vld [vmem:[%s773_s16 + $0x20] sm:$0xf] }
  0x29   : > { %v224_v14 = vsel %vm217_vm0, %v215_v10, 0.0  ;;  %v218_v15 = vsel %vm217_vm0, %v213_v11, 0.0  ;;  %v227_v18 = vsel %vm217_vm0, %v216_v16, 0.0  ;;  %v515_v29 = vor.u32 %v532_v26, %v512_v28  ;;  %v531_v32 = vld [vmem:[%s773_s16 + $0x24] sm:$0xf0]  ;;  %p614_p0 = pnand %p613_p13, %p717_p6  ;;  %p619_p4 = por %p618_p3, %p617_p2 }
  0x2a   : > { %225 = vadd.xlane.f32.xlu0 %v224_v14  ;;  %219 = vadd.xlane.f32.xlu1 %v218_v15  ;;  %v221_v19 = vsel %vm217_vm0, %v214_v17, 0.0  ;;  %v530_v33 = vld [vmem:[%s773_s16 + $0x24] sm:$0xf]  ;;  %v503_v34 = vor.u32 %v531_v32, %v502_v31  ;;  %v504_v35 = vld [vmem:[%s773_s16 + $0x28] sm:$0xf0] }
  0x2b   : > { %349 = vmatpush.bf16.msra.mxu0 %v511_v27  ;;  %535 = vmatpush.bf16.msra.mxu2 %v511_v27  ;;  %v507_v36 = vor.u32 %v530_v33, %v504_v35  ;;  %v494_v38 = vld [vmem:[%s773_s16 + $0x10] sm:$0xf]  ;;  %v529_v39 = vld [vmem:[%s773_s16 + $0x14] sm:$0xf0]  ;;  %v528_v40 = vld [vmem:[%s773_s16 + $0x14] sm:$0xf]  ;;  %p615_p1 = pneg %p614_p0 }
  0x2c   : > { %368 = vmatpush.bf16.msra.mxu1 %v515_v29  ;;  %539 = vmatpush.bf16.msra.mxu3 %v515_v29  ;;  %v495_v41 = vor.u32 %v529_v39, %v494_v38  ;;  %v496_v42 = vld [vmem:[%s773_s16 + $0x18] sm:$0xf0]  ;;  %v486_v44 = vld [vmem:[%s773_s16] sm:$0xf]  ;;  %v527_v45 = vld [vmem:[%s773_s16 + $0x4] sm:$0xf0] }
  0x2d   : > { %v587_v21 = vpop.eup %586  ;;  %v499_v43 = vor.u32 %v528_v40, %v496_v42  ;;  %v526_v46 = vld [vmem:[%s773_s16 + $0x4] sm:$0xf]  ;;  %v487_v48 = vor.u32 %v527_v45, %v486_v44  ;;  %v488_v49 = vld [vmem:[%s773_s16 + $0x8] sm:$0xf0]  ;;  %p620_p5 = pnand %p619_p4, %p615_p1 }
  0x2e   : > { %v231_v22 = vmul.f32 64.0, %v587_v21  ;;  %vm235_vm1 = vweird.f32 %v587_v21  ;;  %v491_v50 = vor.u32 %v526_v46, %v488_v49 }
  0x2f   : > { %350 = vmatpush.bf16.msra.mxu0 %v503_v34  ;;  %536 = vmatpush.bf16.msra.mxu2 %v503_v34 }
  0x30   : > { %v232_v23 = vsub.f32 1.0, %v231_v22  ;;  %369 = vmatpush.bf16.msra.mxu1 %v507_v36  ;;  %540 = vmatpush.bf16.msra.mxu3 %v507_v36 }
  0x32   : > { %228 = vadd.xlane.f32.xlu0 %v227_v18  ;;  %222 = vadd.xlane.f32.xlu1 %v221_v19  ;;  %v233_v30 = vmul.f32 %v587_v21, %v232_v23 }
  0x33   : > { %351 = vmatpush.bf16.msra.mxu0 %v495_v41  ;;  %537 = vmatpush.bf16.msra.mxu2 %v495_v41 }
  0x34   : > { %v234_v37 = vadd.f32 %v587_v21, %v233_v30  ;;  %370 = vmatpush.bf16.msra.mxu1 %v499_v43  ;;  %541 = vmatpush.bf16.msra.mxu3 %v499_v43 }
  0x36   : > { %v236_v47 = vsel %vm235_vm1, %v587_v21, %v234_v37 }
  0x37   : > { %352 = vmatpush.bf16.msra.mxu0 %v487_v48  ;;  %538 = vmatpush.bf16.msra.mxu2 %v487_v48 }
  0x38   : > { %371 = vmatpush.bf16.msra.mxu1 %v491_v50  ;;  %542 = vmatpush.bf16.msra.mxu3 %v491_v50 }
  0x9d   : > { %v226_v51 = vpop.xlane.xlu0 %225  ;;  %v220_v52 = vpop.xlane.xlu1 %219 }
  0x9e   : > { %v239_v53 = vmul.f32 %v236_v47, %v226_v51  ;;  %v237_v54 = vmul.f32 %v236_v47, %v220_v52 }
  0xa0   : > { %v243_v55 = vadd.f32 1.1920929e-07, %v239_v53  ;;  %v241_v56 = vadd.f32 1.1920929e-07, %v237_v54 }
  0xa2   : > { %588 = vrsqrt.f32 %v243_v55  ;;  %vm251_vm3 = vweird.f32 %v241_v56  ;;  %vm271_vm5 = vweird.f32 %v243_v55 }
  0xa3   : > { %590 = vrsqrt.f32 %v241_v56 }
  0xa5   : > { %v229_v57 = vpop.xlane.xlu0 %228  ;;  %v223_v58 = vpop.xlane.xlu1 %222 }
  0xa6   : > { %v240_v59 = vmul.f32 %v236_v47, %v229_v57  ;;  %v238_v60 = vmul.f32 %v236_v47, %v223_v58 }
  0xa8   : > { %v589_v61 = vpop.eup %588  ;;  %v244_v62 = vadd.f32 1.1920929e-07, %v240_v59  ;;  %v242_v63 = vadd.f32 1.1920929e-07, %v238_v60 }
  0xa9   : > { %v591_v0 = vpop.eup %590  ;;  %v266_v1 = vmul.f32 %v589_v61, %v243_v55  ;;  %vm272_vm2 = vweird.f32 %v589_v61 }
  0xaa   : > { %v246_v2 = vmul.f32 %v591_v0, %v241_v56  ;;  %592 = vrsqrt.f32 %v244_v62  ;;  %vm252_vm4 = vweird.f32 %v591_v0  ;;  %vm273_vm7 = vmor %vm271_vm5, %vm272_vm2  ;;  %vm261_vm8 = vweird.f32 %v242_v63 }
  0xab   : > { %v267_v3 = vmul.f32 %v589_v61, %v266_v1  ;;  %594 = vrsqrt.f32 %v242_v63  ;;  %vm253_vm10 = vmor %vm251_vm3, %vm252_vm4  ;;  %vm281_vm11 = vweird.f32 %v244_v62 }
  0xac   : > { %v247_v4 = vmul.f32 %v591_v0, %v246_v2 }
  0xad   : > { %v268_v5 = vmul.f32 0.5, %v267_v3 }
  0xae   : > { %v248_v6 = vmul.f32 0.5, %v247_v4 }
  0xaf   : > { %v269_v11 = vsub.f32 1.5, %v268_v5 }
  0xb0   : > { %v593_v7 = vpop.eup %592  ;;  %v249_v15 = vsub.f32 1.5, %v248_v6 }
  0xb1   : > { %v595_v10 = vpop.eup %594  ;;  %v276_v14 = vmul.f32 %v593_v7, %v244_v62  ;;  %v270_v19 = vmul.f32 %v589_v61, %v269_v11  ;;  %vm282_vm6 = vweird.f32 %v593_v7 }
  0xb2   : > { %v256_v16 = vmul.f32 %v595_v10, %v242_v63  ;;  %v250_v21 = vmul.f32 %v591_v0, %v249_v15  ;;  %vm262_vm9 = vweird.f32 %v595_v10  ;;  %vm283_vm12 = vmor %vm281_vm11, %vm282_vm6 }
  0xb3   : > { %v277_v17 = vmul.f32 %v593_v7, %v276_v14  ;;  %v274_v26 = vsel %vm273_vm7, %v589_v61, %v270_v19  ;;  %vm263_vm13 = vmor %vm261_vm8, %vm262_vm9 }
  0xb4   : > { %v257_v18 = vmul.f32 %v595_v10, %v256_v16  ;;  %v254_v28 = vsel %vm253_vm10, %v591_v0, %v250_v21  ;;  %v287_v31 = vmul.f32 %v274_v26, %v738_v8 }
  0xb5   : > { %v278_v20 = vmul.f32 0.5, %v277_v17  ;;  %v285_v33 = vmul.f32 %v254_v28, %v743_v9 }
  0xb6   : > { %v258_v22 = vmul.f32 0.5, %v257_v18 }
  0xb7   : > { %v279_v23 = vsub.f32 1.5, %v278_v20 }
  0xb8   : > { %v259_v24 = vsub.f32 1.5, %v258_v22 }
  0xb9   : > { %v280_v25 = vmul.f32 %v593_v7, %v279_v23 }
  0xba   : > { %v260_v27 = vmul.f32 %v595_v10, %v259_v24 }
  0xbb   : > { %v284_v29 = vsel %vm283_vm12, %v593_v7, %v280_v25 }
  0xbc   : > { %v264_v30 = vsel %vm263_vm13, %v595_v10, %v260_v27  ;;  %v288_v32 = vmul.f32 %v284_v29, %v752_v12 }
  0xbd   : > { %v286_v34 = vmul.f32 %v264_v30, %v757_v13 }
  0xbe   : > { %v290_v35 = vpack.c.bf16 %v288_v32, %v287_v31 }
  0xbf   : > { %v289_v36 = vpack.c.bf16 %v286_v34, %v285_v33 }
  0xc0   : > { %517 = vmatmul.msk.bf16.vlgmr.msra.gmra.mxu2 %vm217_vm0, %v290_v35  ;;  %519 = vmatmul.msk.bf16.vlgmr.msra.gmra.mxu3 %vm217_vm0, %v290_v35 }
  0xc1   : > { %516 = vmatmul.msk.bf16.vlgmr.msra.gmra.mxu0 %vm217_vm0, %v289_v36  ;;  %518 = vmatmul.msk.bf16.vlgmr.msra.gmra.mxu1 %vm217_vm0, %v289_v36 }
 0x13e   : > { %v354_v37 = vpop.f32.mrf.mxu0  ;;  %v373_v38 = vpop.f32.mrf.mxu1 }
 0x13f   : > { %383 = vst [vmem:[%s205_s17] sm:$0xff] %v354_v37 }
 0x140   : > { %384 = vst [vmem:[%s205_s17 + $0x8] sm:$0xff] %v373_v38 }
 0x143   : > { %v359_v8 = vpop.f32.mrf.mxu2  ;;  %v378_v9 = vpop.f32.mrf.mxu3 }
 0x144   : > { %387 = vst [vmem:[%s205_s17 + $0x20] sm:$0xff] %v359_v8 }
 0x145   : > { %388 = vst [vmem:[%s205_s17 + $0x28] sm:$0xff] %v378_v9 }
 0x146   : > { %v356_v12 = vpop.f32.mrf.mxu0  ;;  %v375_v13 = vpop.f32.mrf.mxu1 }
 0x147   : > { %385 = vst [vmem:[%s205_s17 + $0x10] sm:$0xff] %v356_v12 }
 0x148   : > { %386 = vst [vmem:[%s205_s17 + $0x18] sm:$0xff] %v375_v13 }
 0x14b   : > { %v361_v39 = vpop.f32.mrf.mxu2  ;;  %v380_v40 = vpop.f32.mrf.mxu3 }
 0x14c   : > { %389 = vst [vmem:[%s205_s17 + $0x30] sm:$0xff] %v361_v39 }
 0x14d   : > { %390 = vst [vmem:[%s205_s17 + $0x38] sm:$0xff] %v380_v40 }
 0x14e   : > { %623 = shalt.err (!%p620_p5)
}
 0x14f   : > { %s661_s6 = smov 256   ;;  %s662_s7 = smov 512  }
 0x150   : > { %s663_s8 = smov 16  }
 0x151   : > { %543 = dma.vmem_to_hbm [thread:$0]  (%p717_p6), %s405_s25, 1024, %s407_s26, %s392_s13, %s661_s6, %s662_s7, %s663_s8  }
 0x152 PF: > { %s421_s14 = sand.u32 1, %s646_s9   ;;  %p546_p7 = pnand %p477_p9, %p721_p8 }
 0x153   : > { %s422_s16 = scalar_lea.sflag [#allocation4], %s421_s14 }
 0x154   : > { %p547_p10 = pneg %p546_p7 }
 0x156   : > { %641 = dma.done.wait (%p547_p10), %s422_s16, 1024  }
 0x157   : > { %643 = vsyncadd (%p547_p10), %s422_s16, 4294966272  ;;  %p12_p11 = scmp.ge.s32.totalorder %s702_s15, 4   ;;  %s843_s9 = smov %s650_s10 }
 0x158   : > { %s844_s10 = smov %s654_s11  ;;  %s845_s11 = smov %s715_s18 }
 0x159   : > { %s846_s12 = smov %s702_s15  ;;  %14 = sbr.rel (!%p12_p11) target bundleno = 3 (0x3), region = 106 }
 0x15e   :  { %428 = vsyncpa [#allocation4], 1 }
 0x15f   :  { %430 = vsyncpa [#allocation4 + $0x1], 1 }

// kernel: _lambda_.2
= control target key start
LH: loop header
LB: loop body
LE: loop exit
PB: predicated region body
PF: predicated region fallthrough
CT: control target
= control target key end

     0   :  { %s2475_s30 = smov 0   ;;  %s2477_s10 = smov 0   ;;  %s3106_s0 = inlined_call_operand.vmem [shape: f32[32,64], index: 0, kind: input, shape index: {}, may-alias: {0,9}]   ;;  %s3107_s1 = inlined_call_operand.vmem [shape: bf16[2,64,192], index: 1, kind: input, shape index: {}]   ;;  %s3108_s2 = inlined_call_operand.vmem [shape: bf16[2,64,64], index: 2, kind: input, shape index: {}]   ;;  %s3109_s3 = inlined_call_operand.vmem [shape: bf16[2,64,256], index: 3, kind: input, shape index: {}]   ;;  %s3110_s4 = inlined_call_operand.vmem [shape: bf16[2,256,64], index: 4, kind: input, shape index: {}]   ;;  %s3111_s5 = inlined_call_operand.vmem [shape: f32[32,128], index: 5, kind: input, shape index: {}]   ;;  %s3112_s6 = inlined_call_operand.vmem [shape: f32[32,128], index: 6, kind: input, shape index: {}]   ;;  %s3113_s7 = inlined_call_operand.vmem [shape: f32[32,32], index: 7, kind: input, shape index: {}]   ;;  %s3114_s8 = inlined_call_operand.vmem [shape: f32[128,128], index: 8, kind: input, shape index: {}]   ;;  %s3115_s9 = inlined_call_operand.vmem [shape: f32[32,64], index: 9, kind: output, shape index: {}, may-alias: {0,9}]  }
   0x1   :  { %s2479_s11 = smov 0  }
   0x2 LB: > { %s28_s12 = sadd.s32 1, %s2403_s10  ;;  %p2013_p0 = scmp.ge.s32.totalorder %s2407_s11, 1  ;;  %s2407_s11 = sphi %s2479_s11, %s19_s11   ;;  %s2403_s10 = sphi %s2477_s10, %s3117_s10   ;;  %s2399_s30 = sphi %s2475_s30, %s3116_s30  }
   0x3   : > { %p29_p1 = scmp.ge.s32.totalorder %s28_s12, 2  ;;  %p340_p2 = scmp.lt.s32.totalorder %s2407_s11, 3 }
   0x5   : > { %s3119_s12 = smov (%p29_p1, %s28_s12), 0  ;;  %p341_p3 = pnand %p2013_p0, %p340_p2 }
   0x6   : > { %p402_p4 = scmp.lt.s32.totalorder (!%p341_p3), %s2399_s30, 1  ;;  %p2022_p5 = scmp.ne.s32.totalorder (!%p341_p3), %s2399_s30, 0 }
   0x7   : > { %344 = sbr.rel (%p341_p3) target bundleno = 2372 (0x944), region = 56 }
   0xc   : > { %s403_s13 = scalar_select %p402_p4, %s2399_s30, 1 }
   0xd   : > { %432 = sbr.rel (%p2022_p5) target bundleno = 30 (0x1e), region = 60 }
   0xe   : > { %s2211_s14 = sshll.u32 %s403_s13, 6  ;;  %s2212_s15 = sshll.u32 %s403_s13, 5 }
   0xf   : > { %s2496_s18 = scalar_lea.vmem %s3107_s1, %s2211_s14  ;;  %s2501_s21 = scalar_lea.vmem %s3108_s2, %s2212_s15 }
  0x10   : > { %s2506_s24 = scalar_lea.vmem %s3109_s3, %s2211_s14  ;;  %s2214_s25 = sshll.u32 %s403_s13, 7 }
  0x11   : > { %s2511_s28 = scalar_lea.vmem %s3110_s4, %s2214_s25 }
  0x12   : > { %v433_v0 = vld [vmem:[%s3106_s0] sm:$0xff]  ;;  %vm437_vm0 = vcmask 523264   ;;  %v434_v1 = vld [vmem:[%s3106_s0 + $0x8] sm:$0xff]  ;;  %v435_v2 = vld [vmem:[%s3106_s0 + $0x10] sm:$0xff] }
  0x13   : > { %438 = vst.msk [vmem:[%s3115_s9] sm:$0xff] %vm437_vm0, %v433_v0 }
  0x1a   : > { %v436_v3 = vld [vmem:[%s3106_s0 + $0x18] sm:$0xff] }
  0x1b   : > { %439 = vst.msk [vmem:[%s3115_s9 + $0x8] sm:$0xff] %vm437_vm0, %v434_v1 }
  0x1c   : > { %440 = vst.msk [vmem:[%s3115_s9 + $0x10] sm:$0xff] %vm437_vm0, %v435_v2 }
  0x1d   : > { %441 = vst.msk [vmem:[%s3115_s9 + $0x18] sm:$0xff] %vm437_vm0, %v436_v3 }
  0x1e PF: > { %vm534_vm1 = vcmask 523264   ;;  %v2545_v5 = vld [vmem:[%s3115_s9] sm:$0xff]  ;;  %v2409_v16 = vmov 64.0   ;;  %v2049_v20 = vld [vmem:[%s2496_s18 + $0x30] sm:$0xf]  ;;  %v529_v1 = vld [vmem:[%s3114_s8 + $0x78] sm:$0xff] }
  0x1f   : > { %v530_v7 = vmul.f32 %v2545_v5, %v2545_v5  ;;  %2291 = vrcp.f32 %v2409_v16  ;;  %v2222_v21 = vld [vmem:[%s2496_s18 + $0x34] sm:$0xf0]  ;;  %v2221_v22 = vld [vmem:[%s2496_s18 + $0x34] sm:$0xf]  ;;  %v2051_v24 = vld [vmem:[%s2496_s18 + $0x38] sm:$0xf0]  ;;  %696 = vmatpush.msra.mxu2 %v529_v1 }
  0x20   : > { %v2050_v23 = vor.u32 %v2222_v21, %v2049_v20  ;;  %v2054_v25 = vor.u32 %v2221_v22, %v2051_v24  ;;  %v2041_v27 = vld [vmem:[%s2496_s18 + $0x20] sm:$0xf]  ;;  %v2220_v28 = vld [vmem:[%s2496_s18 + $0x24] sm:$0xf0]  ;;  %v2219_v29 = vld [vmem:[%s2496_s18 + $0x24] sm:$0xf] }
  0x21   : > { %v535_v11 = vsel %vm534_vm1, %v530_v7, 0.0  ;;  %v2042_v30 = vor.u32 %v2220_v28, %v2041_v27  ;;  %v2043_v31 = vld [vmem:[%s2496_s18 + $0x28] sm:$0xf0]  ;;  %v2033_v34 = vld [vmem:[%s2496_s18 + $0x10] sm:$0xf]  ;;  %s2410_s25 = smov 64  }
  0x22   : > { %v2559_v9 = vld [vmem:[%s3115_s9 + $0x8] sm:$0xff]  ;;  %536 = vadd.xlane.f32.xlu0 %v535_v11  ;;  %658 = vmatpush.bf16.msra.mxu0 %v2050_v23  ;;  %v2046_v32 = vor.u32 %v2219_v29, %v2043_v31  ;;  %v2218_v35 = vld [vmem:[%s2496_s18 + $0x14] sm:$0xf0]  ;;  %v2217_v36 = vld [vmem:[%s2496_s18 + $0x14] sm:$0xf]  ;;  %s2411_s29 = smov 88  }
  0x23   : > { %v2540_v4 = vld [vmem:[%s3115_s9 + $0x10] sm:$0xff]  ;;  %v531_v13 = vmul.f32 %v2559_v9, %v2559_v9  ;;  %677 = vmatpush.bf16.msra.mxu1 %v2054_v25  ;;  %v2034_v37 = vor.u32 %v2218_v35, %v2033_v34  ;;  %v2035_v38 = vld [vmem:[%s2496_s18 + $0x18] sm:$0xf0]  ;;  %v2025_v40 = vld [vmem:[%s2496_s18] sm:$0xf]  ;;  %s2412_s16 = smov 32  }
  0x24   : > { %v532_v6 = vmul.f32 %v2540_v4, %v2540_v4  ;;  %v2554_v8 = vld [vmem:[%s3115_s9 + $0x18] sm:$0xff]  ;;  %v2038_v39 = vor.u32 %v2217_v36, %v2035_v38  ;;  %v2216_v41 = vld [vmem:[%s2496_s18 + $0x4] sm:$0xf0]  ;;  %v2215_v42 = vld [vmem:[%s2496_s18 + $0x4] sm:$0xf]  ;;  %s2413_s15 = smov 56  }
  0x25   : > { %v533_v12 = vmul.f32 %v2554_v8, %v2554_v8  ;;  %v538_v15 = vsel %vm534_vm1, %v531_v13, 0.0  ;;  %v2292_v17 = vpop.eup %2291  ;;  %v2026_v44 = vor.u32 %v2216_v41, %v2025_v40  ;;  %v2027_v45 = vld [vmem:[%s2496_s18 + $0x8] sm:$0xf0]  ;;  %v528_v2 = vld [vmem:[%s3114_s8 + $0x70] sm:$0xff]  ;;  %v526_v13 = vld [vmem:[%s3114_s8 + $0x60] sm:$0xff]  ;;  %s2414_s17 = smov 24  }
  0x26   : > { %v541_v10 = vsel %vm534_vm1, %v532_v6, 0.0  ;;  %v548_v18 = vmul.f32 64.0, %v2292_v17  ;;  %659 = vmatpush.bf16.msra.mxu0 %v2042_v30  ;;  %vm552_vm2 = vweird.f32 %v2292_v17  ;;  %v2030_v46 = vor.u32 %v2215_v42, %v2027_v45  ;;  %697 = vmatpush.msra.mxu2 %v528_v2  ;;  %v524_v20 = vld [vmem:[%s3114_s8 + $0x50] sm:$0xff]  ;;  %v523_v24 = vld [vmem:[%s3114_s8 + $0x48] sm:$0xff]  ;;  %v522_v29 = vld [vmem:[%s3114_s8 + $0x40] sm:$0xff]  ;;  %s2415_s19 = smov 120  }
  0x27   : > { %542 = vadd.xlane.f32.xlu1 %v541_v10  ;;  %v544_v14 = vsel %vm534_vm1, %v533_v12, 0.0  ;;  %678 = vmatpush.bf16.msra.mxu1 %v2046_v32  ;;  %v527_v10 = vld [vmem:[%s3114_s8 + $0x68] sm:$0xff]  ;;  %v521_v32 = vld [vmem:[%s3114_s8 + $0x38] sm:$0xff]  ;;  %v518_v36 = vld [vmem:[%s3114_s8 + $0x20] sm:$0xff]  ;;  %s2416_s14 = smov 96   ;;  %s2417_s27 = smov 112  }
  0x28   : > { %v549_v19 = vsub.f32 1.0, %v548_v18  ;;  %698 = vmatpush.msra.mxu2 %v527_v10  ;;  %v519_v34 = vld [vmem:[%s3114_s8 + $0x28] sm:$0xff]  ;;  %v517_v38 = vld [vmem:[%s3114_s8 + $0x18] sm:$0xff]  ;;  %v516_v40 = vld [vmem:[%s3114_s8 + $0x10] sm:$0xff]  ;;  %s2424_s13 = smov 40  }
  0x2a   : > { %539 = vadd.xlane.f32.xlu0 %v538_v15  ;;  %v550_v26 = vmul.f32 %v2292_v17, %v549_v19  ;;  %660 = vmatpush.bf16.msra.mxu0 %v2034_v37 }
  0x2b   : > { %679 = vmatpush.bf16.msra.mxu1 %v2038_v39  ;;  %699 = vmatpush.msra.mxu2 %v526_v13 }
  0x2c   : > { %v551_v33 = vadd.f32 %v2292_v17, %v550_v26 }
  0x2e   : > { %v2584_v43 = vsel %vm552_vm2, %v2292_v17, %v551_v33  ;;  %661 = vmatpush.bf16.msra.mxu0 %v2026_v44  ;;  %v525_v17 = vld [vmem:[%s3114_s8 + $0x58] sm:$0xff] }
  0x2f   : > { %545 = vadd.xlane.f32.xlu1 %v544_v14  ;;  %680 = vmatpush.bf16.msra.mxu1 %v2030_v46  ;;  %v515_v46 = vld [vmem:[%s3114_s8 + $0x8] sm:$0xff] }
  0x30   : > { %700 = vmatpush.msra.mxu2 %v525_v17 }
  0x32   : > { %701 = vmatpush.msra.mxu2 %v524_v20 }
  0x34   : > { %702 = vmatpush.msra.mxu2 %v523_v24 }
  0x36   : > { %703 = vmatpush.msra.mxu2 %v522_v29 }
  0x38   : > { %704 = vmatpush.msra.mxu2 %v521_v32 }
  0x95   : > { %v537_v48 = vpop.xlane.xlu0 %536 }
  0x96   : > { %v554_v49 = vmul.f32 %v2584_v43, %v537_v48 }
  0x98   : > { %v558_v50 = vadd.f32 1.1920929e-07, %v554_v49 }
  0x9a   : > { %v543_v47 = vpop.xlane.xlu1 %542  ;;  %2293 = vrsqrt.f32 %v558_v50  ;;  %vm568_vm4 = vweird.f32 %v558_v50 }
  0x9b   : > { %v556_v51 = vmul.f32 %v2584_v43, %v543_v47  ;;  %v514_v47 = vld [vmem:[%s3114_s8] sm:$0xff] }
  0x9d   : > { %v540_v53 = vpop.xlane.xlu0 %539  ;;  %v2593_v59 = vadd.f32 1.1920929e-07, %v556_v51 }
  0x9e   : > { %v555_v55 = vmul.f32 %v2584_v43, %v540_v53 }
  0x9f   : > { %vm588_vm11 = vweird.f32 %v2593_v59 }
  0xa0   : > { %v559_v57 = vadd.f32 1.1920929e-07, %v555_v55  ;;  %v2294_v58 = vpop.eup %2293 }
  0xa1   : > { %v563_v60 = vmul.f32 %v2294_v58, %v558_v50  ;;  %vm569_vm3 = vweird.f32 %v2294_v58 }
  0xa2   : > { %v546_v52 = vpop.xlane.xlu1 %545  ;;  %vm570_vm6 = vmor %vm568_vm4, %vm569_vm3  ;;  %vm578_vm7 = vweird.f32 %v559_v57 }
  0xa3   : > { %v557_v54 = vmul.f32 %v2584_v43, %v546_v52  ;;  %v564_v61 = vmul.f32 %v2294_v58, %v563_v60 }
  0xa5   : > { %v2591_v56 = vadd.f32 1.1920929e-07, %v557_v54  ;;  %v565_v62 = vmul.f32 0.5, %v564_v61 }
  0xa7   : > { %2295 = vrsqrt.f32 %v2591_v56  ;;  %v566_v3 = vsub.f32 1.5, %v565_v62  ;;  %vm598_vm9 = vweird.f32 %v2591_v56 }
  0xa8   : > { %2297 = vrsqrt.f32 %v559_v57 }
  0xa9   : > { %2299 = vrsqrt.f32 %v2593_v59  ;;  %v567_v15 = vmul.f32 %v2294_v58, %v566_v3 }
  0xab   : > { %v571_v23 = vsel %vm570_vm6, %v2294_v58, %v567_v15 }
  0xac   : > { %v602_v27 = vmul.f32 %v571_v23, %v2545_v5  ;;  %v520_v5 = vld [vmem:[%s3114_s8 + $0x30] sm:$0xff] }
  0xad   : > { %v2597_v63 = vpop.eup %2295  ;;  %705 = vmatpush.msra.mxu2 %v520_v5 }
  0xae   : > { %v2298_v0 = vpop.eup %2297  ;;  %v593_v11 = vmul.f32 %v2597_v63, %v2591_v56  ;;  %vm599_vm10 = vweird.f32 %v2597_v63 }
  0xaf   : > { %v573_v6 = vmul.f32 %v2298_v0, %v559_v57  ;;  %v2605_v7 = vpop.eup %2299  ;;  %vm579_vm5 = vweird.f32 %v2298_v0  ;;  %vm600_vm13 = vmor %vm598_vm9, %vm599_vm10  ;;  %706 = vmatpush.msra.mxu2 %v519_v34 }
  0xb0   : > { %v583_v14 = vmul.f32 %v2605_v7, %v2593_v59  ;;  %v594_v18 = vmul.f32 %v2597_v63, %v593_v11  ;;  %vm580_vm8 = vmor %vm578_vm7, %vm579_vm5  ;;  %vm589_vm12 = vweird.f32 %v2605_v7 }
  0xb1   : > { %v574_v12 = vmul.f32 %v2298_v0, %v573_v6  ;;  %vm590_vm14 = vmor %vm588_vm11, %vm589_vm12  ;;  %707 = vmatpush.msra.mxu2 %v518_v36  ;;  %vm811_vm12 = vcmask 64512  }
  0xb2   : > { %v584_v21 = vmul.f32 %v2605_v7, %v583_v14  ;;  %v595_v25 = vmul.f32 0.5, %v594_v18 }
  0xb3   : > { %v575_v16 = vmul.f32 0.5, %v574_v12  ;;  %708 = vmatpush.msra.mxu2 %v517_v38  ;;  %v508_v38 = vld [vmem:[%s3112_s6 + $0x10] sm:$0xff] }
  0xb4   : > { %v585_v30 = vmul.f32 0.5, %v584_v21  ;;  %v596_v33 = vsub.f32 1.5, %v595_v25 }
  0xb5   : > { %v576_v19 = vsub.f32 1.5, %v575_v16  ;;  %709 = vmatpush.msra.mxu2 %v516_v40  ;;  %v504_v40 = vld [vmem:[%s3111_s5 + $0x10] sm:$0xff] }
  0xb6   : > { %v597_v35 = vmul.f32 %v2597_v63, %v596_v33 }
  0xb7   : > { %v577_v22 = vmul.f32 %v2298_v0, %v576_v19  ;;  %710 = vmatpush.msra.mxu2 %v515_v46 }
  0xb8   : > { %v601_v39 = vsel %vm600_vm13, %v2597_v63, %v597_v35  ;;  %vm882_vm13 = vcmask 261120  }
  0xb9   : > { %v581_v26 = vsel %vm580_vm8, %v2298_v0, %v577_v22  ;;  %v605_v42 = vmul.f32 %v601_v39, %v2554_v8  ;;  %711 = vmatpush.msra.mxu2 %v514_v47  ;;  %v506_v47 = vld [vmem:[%s3112_s6] sm:$0xff] }
  0xba   : > { %v603_v28 = vmul.f32 %v581_v26, %v2559_v9  ;;  %v586_v9 = vsub.f32 1.5, %v585_v30 }
  0xbc   : > { %v606_v31 = vpack.c.bf16 %v603_v28, %v602_v27  ;;  %v587_v37 = vmul.f32 %v2605_v7, %v586_v9 }
  0xbe   : > { %2055 = vmatmul.msk.bf16.vlgmr.msra.gmra.mxu0 %vm534_vm1, %v606_v31  ;;  %2057 = vmatmul.msk.bf16.vlgmr.msra.gmra.mxu1 %vm534_vm1, %v606_v31  ;;  %v591_v41 = vsel %vm590_vm14, %v2605_v7, %v587_v37  ;;  %vm1127_vm14 = vcmask 130048  }
  0xbf   : > { %v604_v44 = vmul.f32 %v591_v41, %v2540_v4 }
  0xc1   : > { %v607_v45 = vpack.c.bf16 %v605_v42, %v604_v44  ;;  %v505_v44 = vld [vmem:[%s3111_s5 + $0x18] sm:$0xff] }
  0xce   : > { %2056 = vmatmul.msk.bf16.gmra.mxu0 %vm534_vm1, %v607_v45  ;;  %2058 = vmatmul.msk.bf16.gmra.mxu1 %vm534_vm1, %v607_v45  ;;  %v509_v45 = vld [vmem:[%s3112_s6 + $0x18] sm:$0xff] }
 0x13b   : > { %v663_v48 = vpop.f32.mrf.mxu0  ;;  %v682_v8 = vpop.f32.mrf.mxu1 }
 0x13c   : > { %v692_v49 = vmul.f32 %v663_v48, %v663_v48 }
 0x13e   : > { %712 = vmatmul.f32.vlgmr.msra.gmra.mxu2 %v692_v49 }
 0x143   : > { %v665_v4 = vpop.f32.mrf.mxu0  ;;  %v684_v50 = vpop.f32.mrf.mxu1 }
 0x144   : > { %v693_v51 = vmul.f32 %v665_v4, %v665_v4  ;;  %v2682_v59 = vpack.c.bf16 %v684_v50, %v682_v8  ;;  %v502_v50 = vld [vmem:[%s3111_s5] sm:$0xff] }
 0x146   : > { %715 = vmatmul.f32.gmra.mxu2 %v693_v51 }
 0x14b   : > { %v2671_v52 = vpop.f32.mrf.mxu0  ;;  %v687_v53 = vpop.f32.mrf.mxu1 }
 0x14c   : > { %v694_v54 = vmul.f32 %v2671_v52, %v2671_v52 }
 0x14e   : > { %718 = vmatmul.f32.gmra.mxu2 %v694_v54 }
 0x153   : > { %v2675_v55 = vpop.f32.mrf.mxu0  ;;  %v689_v56 = vpop.f32.mrf.mxu1 }
 0x154   : > { %v2677_v57 = vpack.c.bf16 %v689_v56, %v687_v53  ;;  %v695_v58 = vmul.f32 %v2675_v55, %v2675_v55  ;;  %v503_v56 = vld [vmem:[%s3111_s5 + $0x8] sm:$0xff] }
 0x156   : > { %721 = vmatmul.f32.gmra.mxu2 %v695_v58  ;;  %943 = vmatpush.bf16.msrb.mxu1 %v2677_v57  ;;  %v507_v58 = vld [vmem:[%s3112_s6 + $0x8] sm:$0xff] }
 0x15a   : > { %944 = vmatpush.bf16.msrb.mxu1 %v2682_v59 }
 0x1c1   : > { %v713_v60 = vpop.f32.mrf.mxu2 }
 0x1c2   : > { %v714_v61 = vadd.f32 1.1920929e-07, %v713_v60 }
 0x1c4   : > { %2301 = vrsqrt.f32 %v714_v61  ;;  %vm731_vm0 = vweird.f32 %v714_v61 }
 0x1c9   : > { %v716_v62 = vpop.f32.mrf.mxu2 }
 0x1ca   : > { %v2302_v63 = vpop.eup %2301  ;;  %v717_v0 = vadd.f32 1.1920929e-07, %v716_v62 }
 0x1cb   : > { %v726_v1 = vmul.f32 %v2302_v63, %v714_v61  ;;  %vm732_vm15 = vweird.f32 %v2302_v63 }
 0x1cc   : > { %2303 = vrsqrt.f32 %v717_v0  ;;  %vm733_vm2 = vmor %vm731_vm0, %vm732_vm15  ;;  %vm741_vm4 = vweird.f32 %v717_v0 }
 0x1cd   : > { %v727_v2 = vmul.f32 %v2302_v63, %v726_v1 }
 0x1cf   : > { %v728_v3 = vmul.f32 0.5, %v727_v2 }
 0x1d1   : > { %v729_v6 = vsub.f32 1.5, %v728_v3  ;;  %v719_v7 = vpop.f32.mrf.mxu2 }
 0x1d2   : > { %v2304_v10 = vpop.eup %2303  ;;  %v720_v11 = vadd.f32 1.1920929e-07, %v719_v7 }
 0x1d3   : > { %v736_v12 = vmul.f32 %v2304_v10, %v717_v0  ;;  %v730_v13 = vmul.f32 %v2302_v63, %v729_v6  ;;  %vm742_vm3 = vweird.f32 %v2304_v10 }
 0x1d4   : > { %2305 = vrsqrt.f32 %v720_v11  ;;  %vm743_vm5 = vmor %vm741_vm4, %vm742_vm3  ;;  %vm751_vm7 = vweird.f32 %v720_v11 }
 0x1d5   : > { %v737_v14 = vmul.f32 %v2304_v10, %v736_v12  ;;  %v734_v15 = vsel %vm733_vm2, %v2302_v63, %v730_v13 }
 0x1d6   : > { %v765_v16 = vmul.f32 %v734_v15, %v663_v48 }
 0x1d7   : > { %v738_v17 = vmul.f32 0.5, %v737_v14 }
 0x1d8   : > { %769 = vrot.lane.b32.xlu0 %v765_v16, %s2410_s25  ;;  %v777_v54 = vmul.f32 %v765_v16, %v502_v50 }
 0x1d9   : > { %v739_v18 = vsub.f32 1.5, %v738_v17  ;;  %v722_v19 = vpop.f32.mrf.mxu2 }
 0x1da   : > { %v2306_v20 = vpop.eup %2305  ;;  %v723_v21 = vadd.f32 1.1920929e-07, %v722_v19 }
 0x1db   : > { %v746_v22 = vmul.f32 %v2306_v20, %v720_v11  ;;  %v740_v23 = vmul.f32 %v2304_v10, %v739_v18  ;;  %vm752_vm6 = vweird.f32 %v2306_v20 }
 0x1dc   : > { %2307 = vrsqrt.f32 %v723_v21  ;;  %vm753_vm8 = vmor %vm751_vm7, %vm752_vm6  ;;  %vm761_vm10 = vweird.f32 %v723_v21 }
 0x1dd   : > { %v747_v24 = vmul.f32 %v2306_v20, %v746_v22  ;;  %v744_v25 = vsel %vm743_vm5, %v2304_v10, %v740_v23 }
 0x1de   : > { %v766_v26 = vmul.f32 %v744_v25, %v665_v4 }
 0x1df   : > { %v748_v27 = vmul.f32 0.5, %v747_v24 }
 0x1e0   : > { %771 = vrot.lane.b32.xlu1 %v766_v26, %s2410_s25  ;;  %v778_v1 = vmul.f32 %v766_v26, %v503_v56 }
 0x1e1   : > { %v749_v28 = vsub.f32 1.5, %v748_v27 }
 0x1e2   : > { %v2308_v29 = vpop.eup %2307 }
 0x1e3   : > { %v756_v30 = vmul.f32 %v2308_v29, %v723_v21  ;;  %v750_v31 = vmul.f32 %v2306_v20, %v749_v28  ;;  %vm762_vm9 = vweird.f32 %v2308_v29 }
 0x1e4   : > { %vm763_vm11 = vmor %vm761_vm10, %vm762_vm9 }
 0x1e5   : > { %v757_v32 = vmul.f32 %v2308_v29, %v756_v30  ;;  %v754_v33 = vsel %vm753_vm8, %v2306_v20, %v750_v31 }
 0x1e6   : > { %v767_v5 = vmul.f32 %v754_v33, %v2671_v52 }
 0x1e7   : > { %v758_v9 = vmul.f32 0.5, %v757_v32 }
 0x1e8   : > { %773 = vrot.lane.b32.xlu2 %v767_v5, %s2410_s25  ;;  %v779_v42 = vmul.f32 %v767_v5, %v504_v40 }
 0x1e9   : > { %v759_v34 = vsub.f32 1.5, %v758_v9 }
 0x1eb   : > { %v760_v35 = vmul.f32 %v2308_v29, %v759_v34 }
 0x1ed   : > { %v764_v36 = vsel %vm763_vm11, %v2308_v29, %v760_v35 }
 0x1ee   : > { %v768_v37 = vmul.f32 %v764_v36, %v2675_v55 }
 0x1f0   : > { %775 = vrot.lane.b32.xlu2 %v768_v37, %s2410_s25  ;;  %v780_v49 = vmul.f32 %v768_v37, %v505_v44  ;;  %v2759_v37 = vld [vmem:[%s3113_s7] sm:$0xff]  ;;  %v2766_v44 = vld [vmem:[%s3113_s7 + $0x8] sm:$0xff] }
 0x242   : > { %v774_v39 = vpop.permute.xlu2 %773 }
 0x243   : > { %v783_v41 = vmul.f32 %v774_v39, %v508_v38 }
 0x245   : > { %v787_v46 = vadd.f32 %v783_v41, %v779_v42 }
 0x247   : > { %v791_v51 = vpack.c.bf16 %v787_v46, %v787_v46 }
 0x249   : > { %v799_v60 = vunpack.c.l.b16 %v791_v51 }
 0x24a   : > { %v770_v48 = vpop.permute.xlu0 %769  ;;  %v776_v8 = vpop.permute.xlu2 %775 }
 0x24b   : > { %v784_v4 = vmul.f32 %v776_v8, %v509_v45  ;;  %v781_v52 = vmul.f32 %v770_v48, %v506_v47 }
 0x24d   : > { %v788_v53 = vadd.f32 %v784_v4, %v780_v49  ;;  %v785_v61 = vadd.f32 %v781_v52, %v777_v54  ;;  %v2773_v49 = vld [vmem:[%s3113_s7 + $0x10] sm:$0xff]  ;;  %v2780_v54 = vld [vmem:[%s3113_s7 + $0x18] sm:$0xff] }
 0x24f   : > { %v792_v55 = vpack.c.bf16 %v788_v53, %v788_v53  ;;  %v789_v3 = vpack.c.bf16 %v785_v61, %v785_v61 }
 0x251   : > { %v800_v62 = vunpack.c.l.b16 %v792_v55  ;;  %v797_v10 = vunpack.c.l.b16 %v789_v3 }
 0x252   : > { %v772_v63 = vpop.permute.xlu1 %771 }
 0x253   : > { %v2715_v0 = vpack.c.b16 %v800_v62, %v799_v60  ;;  %v782_v2 = vmul.f32 %v772_v63, %v507_v58 }
 0x255   : > { %v786_v6 = vadd.f32 %v782_v2, %v778_v1  ;;  %1003 = vrot.lane.b32.xlu1 %v2715_v0, %s2411_s29  ;;  %805 = vrot.lane.b32.xlu0 %v2715_v0, %s2410_s25 }
 0x256   : > { %809 = vrot.lane.b32.xlu2 %v2715_v0, %s2412_s16 }
 0x257   : > { %v790_v7 = vpack.c.bf16 %v786_v6, %v786_v6 }
 0x259   : > { %v798_v11 = vunpack.c.l.b16 %v790_v7 }
 0x25b   : > { %v2721_v12 = vpack.c.b16 %v798_v11, %v797_v10 }
 0x25d   : > { %958 = vrot.lane.b32.xlu1 %v2721_v12, %s2413_s15  ;;  %962 = vrot.lane.b32.xlu0 %v2721_v12, %s2414_s17 }
 0x25e   : > { %807 = vrot.lane.b32.xlu2 %v2721_v12, %s2412_s16  ;;  %s2419_s16 = smov 80  }
 0x265   : > { %999 = vrot.lane.b32.xlu1 %v2715_v0, %s2415_s19  ;;  %997 = vrot.lane.b32.xlu0 %v2721_v12, %s2415_s19  ;;  %s2422_s19 = smov 72  }
 0x266   : > { %803 = vrot.lane.b32.xlu2 %v2721_v12, %s2410_s25  ;;  %s2423_s25 = smov 104  }
 0x26d   : > { %845 = vrot.lane.b32.xlu1 %v2715_v0, %s2416_s14 }
 0x26e   : > { %964 = vrot.lane.b32.xlu2 %v2715_v0, %s2414_s17  ;;  %s2421_s17 = smov 8  }
 0x276   : > { %1001 = vrot.lane.b32.xlu2 %v2721_v12, %s2411_s29  ;;  %s2418_s29 = smov 16  }
 0x27e   : > { %960 = vrot.lane.b32.xlu2 %v2715_v0, %s2413_s15  ;;  %s2420_s15 = smov 48  }
 0x2b0   : > { %v810_v13 = vpop.permute.xlu2 %809 }
 0x2b1   : > { %v822_v14 = vsel %vm811_vm12, %v810_v13, 0 }
 0x2b2   : > { %830 = vmatpush.bf16.xpose.msra.mxu3 %v822_v14 }
 0x2b8   : > { %v808_v15 = vpop.permute.xlu2 %807 }
 0x2b9   : > { %v819_v16 = vsel %vm811_vm12, %v808_v15, 0 }
 0x2ba   : > { %831 = vmatpush.bf16.xpose.msra.mxu3 %v819_v16 }
 0x2c0   : > { %v804_v17 = vpop.permute.xlu2 %803 }
 0x2c1   : > { %2059 = vmatmul.msk.bf16.vlgmr.msra.gmra.mxu3 %vm811_vm12, %v804_v17 }
 0x2c7   : > { %v1004_v18 = vpop.permute.xlu1 %1003  ;;  %v806_v19 = vpop.permute.xlu0 %805 }
 0x2c8   : > { %v965_v20 = vpop.permute.xlu2 %964  ;;  %v1015_v21 = vsel %vm811_vm12, %v1004_v18, 0 }
 0x2c9   : > { %v976_v22 = vsel %vm811_vm12, %v965_v20, 0  ;;  %1023 = vmatpush.bf16.xpose.msrb.mxu2 %v1015_v21 }
 0x2ca   : > { %984 = vmatpush.bf16.xpose.msrb.mxu3 %v976_v22 }
 0x2cf   : > { %v959_v23 = vpop.permute.xlu1 %958  ;;  %v963_v24 = vpop.permute.xlu0 %962 }
 0x2d0   : > { %v1002_v25 = vpop.permute.xlu2 %1001  ;;  %v973_v26 = vsel %vm811_vm12, %v963_v24, 0 }
 0x2d1   : > { %2060 = vmatmul.msk.bf16.gmra.mxu3 %vm811_vm12, %v806_v19  ;;  %v1012_v27 = vsel %vm811_vm12, %v1002_v25, 0 }
 0x2d2   : > { %985 = vmatpush.bf16.xpose.msrb.mxu3 %v973_v26  ;;  %1024 = vmatpush.bf16.xpose.msrb.mxu2 %v1012_v27 }
 0x2d7   : > { %v1000_v28 = vpop.permute.xlu1 %999  ;;  %v998_v29 = vpop.permute.xlu0 %997 }
 0x2d8   : > { %v961_v32 = vpop.permute.xlu2 %960 }
 0x2d9   : > { %2067 = vmatmul.msk.bf16.vlgmr.msrb.gmra.mxu2 %vm811_vm12, %v998_v29 }
 0x2df   : > { %v846_v30 = vpop.permute.xlu1 %845 }
 0x2e0   : > { %v857_v31 = vsel %vm811_vm12, %v846_v30, 0 }
 0x2e1   : > { %2065 = vmatmul.msk.bf16.vlgmr.msrb.gmra.mxu3 %vm811_vm12, %v959_v23  ;;  %865 = vmatpush.bf16.xpose.msrb.mxu0 %v857_v31 }
 0x2e9   : > { %2068 = vmatmul.msk.bf16.gmra.mxu2 %vm811_vm12, %v1000_v28 }
 0x2f1   : > { %2066 = vmatmul.msk.bf16.gmra.mxu3 %vm811_vm12, %v961_v32 }
 0x344   : > { %v2748_v33 = vpop.f32.mrf.mxu3 }
 0x34c   : > { %v2750_v5 = vpop.f32.mrf.mxu3 }
 0x354   : > { %v2752_v9 = vpop.f32.mrf.mxu3 }
 0x35c   : > { %v2754_v34 = vpop.f32.mrf.mxu3  ;;  %v1026_v35 = vpop.f32.mrf.mxu2 }
 0x364   : > { %v987_v36 = vpop.f32.mrf.mxu3  ;;  %v1028_v40 = vpop.f32.mrf.mxu2 }
 0x365   : > { %v1027_v38 = vadd.f32 %v1026_v35, %v987_v36 }
 0x367   : > { %v1036_v39 = vadd.f32 %v1027_v38, %v2759_v37 }
 0x369   : > { %v1040_v41 = vsel %vm882_vm13, %v1036_v39, -inf }
 0x36a   : > { %1041 = vmax.xlane.f32.xlu0 %v1040_v41 }
 0x36c   : > { %v989_v42 = vpop.f32.mrf.mxu3  ;;  %v1031_v48 = vpop.f32.mrf.mxu2 }
 0x36d   : > { %v1029_v45 = vadd.f32 %v1028_v40, %v989_v42 }
 0x36f   : > { %v1037_v46 = vadd.f32 %v1029_v45, %v2766_v44 }
 0x371   : > { %v1043_v47 = vsel %vm882_vm13, %v1037_v46, -inf }
 0x372   : > { %1044 = vmax.xlane.f32.xlu2 %v1043_v47 }
 0x374   : > { %v992_v8 = vpop.f32.mrf.mxu3  ;;  %v1033_v52 = vpop.f32.mrf.mxu2 }
 0x375   : > { %v1032_v4 = vadd.f32 %v1031_v48, %v992_v8 }
 0x377   : > { %v1038_v50 = vadd.f32 %v1032_v4, %v2773_v49 }
 0x379   : > { %v1046_v51 = vsel %vm882_vm13, %v1038_v50, -inf }
 0x37a   : > { %1047 = vmax.xlane.f32.xlu1 %v1046_v51 }
 0x37c   : > { %v994_v53 = vpop.f32.mrf.mxu3 }
 0x37d   : > { %v1034_v55 = vadd.f32 %v1033_v52, %v994_v53 }
 0x37f   : > { %v1039_v56 = vadd.f32 %v1034_v55, %v2780_v54 }
 0x381   : > { %v1049_v58 = vsel %vm882_vm13, %v1039_v56, -inf }
 0x382   : > { %1050 = vmax.xlane.f32.xlu0 %v1049_v58 }
 0x38a   : > { %843 = vrot.lane.b32.xlu2 %v2721_v12, %s2416_s14 }
 0x393   : > { %1088 = vrot.lane.b32.xlu1 %v2682_v59, %s2417_s27 }
 0x396   : > { %1090 = vrot.lane.b32.xlu0 %v2677_v57, %s2417_s27 }
 0x39b   : > { %1190 = vrot.lane.b32.xlu1 %v2715_v0, %s2418_s29 }
 0x3a3   : > { %1229 = vrot.lane.b32.xlu1 %v2715_v0, %s2419_s16 }
 0x3ab   : > { %1188 = vrot.lane.b32.xlu1 %v2721_v12, %s2418_s29 }
 0x3dd   : > { %v1042_v60 = vpop.xlane.xlu0 %1041 }
 0x3de   : > { %v1052_v61 = vsub.f32 %v1036_v39, %v1042_v60 }
 0x3e0   : > { %v1056_v62 = vmul.f32 1.442695, %v1052_v61 }
 0x3e2   : > { %2309 = vpow2.f32 %v1056_v62 }
 0x3e5   : > { %v1045_v63 = vpop.xlane.xlu2 %1044 }
 0x3e6   : > { %v1053_v1 = vsub.f32 %v1037_v46, %v1045_v63 }
 0x3e8   : > { %v2794_v2 = vpop.eup %2309  ;;  %v1058_v3 = vmul.f32 1.442695, %v1053_v1 }
 0x3e9   : > { %v1064_v6 = vsel %vm882_vm13, %v2794_v2, 0.0 }
 0x3ea   : > { %2311 = vpow2.f32 %v1058_v3  ;;  %1065 = vadd.xlane.f32.xlu0 %v1064_v6 }
 0x3ed   : > { %v1048_v7 = vpop.xlane.xlu1 %1047  ;;  %v844_v10 = vpop.permute.xlu2 %843 }
 0x3ee   : > { %v1054_v11 = vsub.f32 %v1038_v50, %v1048_v7  ;;  %v854_v13 = vsel %vm811_vm12, %v844_v10, 0 }
 0x3ef   : > { %866 = vmatpush.bf16.xpose.msrb.mxu0 %v854_v13 }
 0x3f0   : > { %v2312_v14 = vpop.eup %2311  ;;  %v1060_v15 = vmul.f32 1.442695, %v1054_v11 }
 0x3f1   : > { %v1067_v16 = vsel %vm882_vm13, %v2312_v14, 0.0 }
 0x3f2   : > { %2313 = vpow2.f32 %v1060_v15  ;;  %1068 = vadd.xlane.f32.xlu1 %v1067_v16 }
 0x3f5   : > { %v1051_v17 = vpop.xlane.xlu0 %1050 }
 0x3f6   : > { %v1055_v18 = vsub.f32 %v1039_v56, %v1051_v17  ;;  %2061 = vmatmul.msk.bf16.vlgmr.msrb.gmra.mxu0 %vm811_vm12, %v2721_v12 }
 0x3f8   : > { %v2802_v19 = vpop.eup %2313  ;;  %v1062_v20 = vmul.f32 1.442695, %v1055_v18 }
 0x3f9   : > { %v1070_v21 = vsel %vm882_vm13, %v2802_v19, 0.0 }
 0x3fa   : > { %2315 = vpow2.f32 %v1062_v20  ;;  %1071 = vadd.xlane.f32.xlu2 %v1070_v21 }
 0x400   : > { %v2806_v22 = vpop.eup %2315 }
 0x401   : > { %v1073_v23 = vsel %vm882_vm13, %v2806_v22, 0.0 }
 0x402   : > { %1074 = vadd.xlane.f32.xlu0 %v1073_v23 }
 0x405   : > { %v1089_v24 = vpop.permute.xlu1 %1088 }
 0x406   : > { %2062 = vmatmul.msk.bf16.gmra.mxu0 %vm811_vm12, %v2715_v0 }
 0x408   : > { %v1091_v25 = vpop.permute.xlu0 %1090 }
 0x409   : > { %1106 = vmatpush.bf16.msra.mxu0 %v1091_v25 }
 0x40b   : > { %1184 = vrot.lane.b32.xlu1 %v2721_v12, %s2420_s15 }
 0x40d   : > { %v1191_v26 = vpop.permute.xlu1 %1190  ;;  %1107 = vmatpush.bf16.msra.mxu0 %v1089_v24 }
 0x40e   : > { %v1202_v27 = vsel %vm811_vm12, %v1191_v26, 0 }
 0x40f   : > { %1210 = vmatpush.bf16.xpose.msra.mxu2 %v1202_v27 }
 0x412   : > { %1227 = vrot.lane.b32.xlu2 %v2721_v12, %s2419_s16 }
 0x413   : > { %1186 = vrot.lane.b32.xlu1 %v2715_v0, %s2420_s15 }
 0x415   : > { %v1230_v28 = vpop.permute.xlu1 %1229 }
 0x416   : > { %v1241_v29 = vsel %vm811_vm12, %v1230_v28, 0  ;;  %1223 = vrot.lane.b32.xlu0 %v2721_v12, %s2417_s27 }
 0x417   : > { %1249 = vmatpush.bf16.xpose.msrb.mxu0 %v1241_v29 }
 0x41a   : > { %1225 = vrot.lane.b32.xlu2 %v2715_v0, %s2417_s27 }
 0x41b   : > { %1386 = vrot.lane.b32.xlu1 %v2715_v0, %s2421_s17 }
 0x41d   : > { %v1189_v30 = vpop.permute.xlu1 %1188 }
 0x41e   : > { %v1199_v31 = vsel %vm811_vm12, %v1189_v30, 0  ;;  %1384 = vrot.lane.b32.xlu0 %v2721_v12, %s2421_s17 }
 0x41f   : > { %1211 = vmatpush.bf16.xpose.msra.mxu2 %v1199_v31 }
 0x422   : > { %1423 = vrot.lane.b32.xlu2 %v2721_v12, %s2422_s19 }
 0x423   : > { %1425 = vrot.lane.b32.xlu1 %v2715_v0, %s2422_s19 }
 0x426   : > { %1419 = vrot.lane.b32.xlu0 %v2721_v12, %s2423_s25 }
 0x42a   : > { %1382 = vrot.lane.b32.xlu2 %v2715_v0, %s2424_s13 }
 0x42b   : > { %1380 = vrot.lane.b32.xlu1 %v2721_v12, %s2424_s13 }
 0x433   : > { %1421 = vrot.lane.b32.xlu1 %v2715_v0, %s2423_s25 }
 0x45d   : > { %v1066_v32 = vpop.xlane.xlu0 %1065 }
 0x45e   : > { %2317 = vrcp.f32 %v1066_v32 }
 0x464   : > { %v2318_v36 = vpop.eup %2317 }
 0x465   : > { %v1069_v35 = vpop.xlane.xlu1 %1068  ;;  %v1080_v39 = vmul.f32 %v2318_v36, %v2794_v2 }
 0x466   : > { %2319 = vrcp.f32 %v1069_v35 }
 0x46c   : > { %v2320_v38 = vpop.eup %2319 }
 0x46d   : > { %v1081_v40 = vmul.f32 %v2320_v38, %v2312_v14  ;;  %v1072_v41 = vpop.xlane.xlu2 %1071 }
 0x46e   : > { %2321 = vrcp.f32 %v1072_v41 }
 0x46f   : > { %v1084_v42 = vpack.c.bf16 %v1081_v40, %v1080_v39 }
 0x471   : > { %2069 = vmatmul.msk.bf16.vlgmr.msra.gmra.mxu0 %vm882_vm13, %v1084_v42 }
 0x473   : > { %v868_v45 = vpop.f32.mrf.mxu0 }
 0x474   : > { %v869_v46 = vadd.f32 %v868_v45, %v2748_v33  ;;  %v2322_v4 = vpop.eup %2321 }
 0x475   : > { %v1075_v12 = vpop.xlane.xlu0 %1074  ;;  %v1228_v47 = vpop.permute.xlu2 %1227  ;;  %v1082_v55 = vmul.f32 %v2322_v4, %v2802_v19 }
 0x476   : > { %2323 = vrcp.f32 %v1075_v12  ;;  %v1238_v0 = vsel %vm811_vm12, %v1228_v47, 0  ;;  %v878_v48 = vadd.f32 %v869_v46, %v2759_v37 }
 0x477   : > { %1250 = vmatpush.bf16.xpose.msrb.mxu0 %v1238_v0 }
 0x478   : > { %v883_v8 = vsel %vm882_vm13, %v878_v48, -inf }
 0x479   : > { %884 = vmax.xlane.f32.xlu0 %v883_v8 }
 0x47b   : > { %v870_v50 = vpop.f32.mrf.mxu0 }
 0x47c   : > { %v2324_v51 = vpop.eup %2323  ;;  %v871_v52 = vadd.f32 %v870_v50, %v2750_v5 }
 0x47d   : > { %v1185_v53 = vpop.permute.xlu1 %1184  ;;  %v1083_v33 = vmul.f32 %v2324_v51, %v2806_v22  ;;  %v1226_v13 = vpop.permute.xlu2 %1225 }
 0x47e   : > { %2083 = vmatmul.msk.bf16.vlgmr.msra.gmra.mxu2 %vm811_vm12, %v1185_v53  ;;  %v879_v56 = vadd.f32 %v871_v52, %v2766_v44 }
 0x47f   : > { %v1085_v58 = vpack.c.bf16 %v1083_v33, %v1082_v55 }
 0x480   : > { %v886_v60 = vsel %vm882_vm13, %v879_v56, -inf }
 0x481   : > { %887 = vmax.xlane.f32.xlu2 %v886_v60  ;;  %2070 = vmatmul.msk.bf16.gmra.mxu0 %vm882_vm13, %v1085_v58 }
 0x483   : > { %v873_v61 = vpop.f32.mrf.mxu0 }
 0x484   : > { %v874_v62 = vadd.f32 %v873_v61, %v2752_v9 }
 0x485   : > { %v1187_v63 = vpop.permute.xlu1 %1186  ;;  %v1424_v17 = vpop.permute.xlu2 %1423 }
 0x486   : > { %v880_v5 = vadd.f32 %v874_v62, %v2773_v49  ;;  %v1434_v19 = vsel %vm811_vm12, %v1424_v17, 0 }
 0x488   : > { %v889_v1 = vsel %vm882_vm13, %v880_v5, -inf  ;;  %v1224_v2 = vpop.permute.xlu0 %1223 }
 0x489   : > { %890 = vmax.xlane.f32.xlu1 %v889_v1 }
 0x48b   : > { %v875_v3 = vpop.f32.mrf.mxu0 }
 0x48c   : > { %v876_v6 = vadd.f32 %v875_v3, %v2754_v34 }
 0x48d   : > { %v1387_v7 = vpop.permute.xlu1 %1386  ;;  %v1383_v20 = vpop.permute.xlu2 %1382 }
 0x48e   : > { %v1398_v10 = vsel %vm811_vm12, %v1387_v7, 0  ;;  %2084 = vmatmul.msk.bf16.gmra.mxu2 %vm811_vm12, %v1187_v63  ;;  %v881_v11 = vadd.f32 %v876_v6, %v2780_v54 }
 0x48f   : > { %1406 = vmatpush.bf16.xpose.msrb.mxu2 %v1398_v10 }
 0x490   : > { %v892_v9 = vsel %vm882_vm13, %v881_v11, -inf  ;;  %v1385_v14 = vpop.permute.xlu0 %1384 }
 0x491   : > { %893 = vmax.xlane.f32.xlu0 %v892_v9  ;;  %2085 = vmatmul.msk.bf16.vlgmr.msrb.gmra.mxu0 %vm811_vm12, %v1224_v2  ;;  %v1395_v16 = vsel %vm811_vm12, %v1385_v14, 0 }
 0x495   : > { %v1426_v15 = vpop.permute.xlu1 %1425 }
 0x496   : > { %v1437_v34 = vsel %vm811_vm12, %v1426_v15, 0 }
 0x497   : > { %1407 = vmatpush.bf16.xpose.msrb.mxu2 %v1395_v16  ;;  %1445 = vmatpush.bf16.xpose.msra.mxu0 %v1437_v34 }
 0x498   : > { %v1420_v21 = vpop.permute.xlu0 %1419 }
 0x49d   : > { %v1381_v18 = vpop.permute.xlu1 %1380 }
 0x49e   : > { %2095 = vmatmul.msk.bf16.vlgmr.msrb.gmra.mxu2 %vm811_vm12, %v1381_v18 }
 0x49f   : > { %1446 = vmatpush.bf16.xpose.msra.mxu0 %v1434_v19 }
 0x4a1   : > { %2086 = vmatmul.msk.bf16.gmra.mxu0 %vm811_vm12, %v1226_v13 }
 0x4a5   : > { %v1422_v22 = vpop.permute.xlu1 %1421 }
 0x4ae   : > { %2096 = vmatmul.msk.bf16.gmra.mxu2 %vm811_vm12, %v1383_v20 }
 0x4b1   : > { %2097 = vmatmul.msk.bf16.vlgmr.msra.gmra.mxu0 %vm811_vm12, %v1420_v21 }
 0x4c1   : > { %2098 = vmatmul.msk.bf16.gmra.mxu0 %vm811_vm12, %v1422_v22 }
 0x4ec   : > { %v885_v23 = vpop.xlane.xlu0 %884 }
 0x4ed   : > { %v895_v24 = vsub.f32 %v878_v48, %v885_v23 }
 0x4ee   : > { %v2861_v25 = vpop.f32.mrf.mxu0 }
 0x4ef   : > { %v899_v26 = vmul.f32 1.442695, %v895_v24 }
 0x4f1   : > { %2325 = vpow2.f32 %v899_v26 }
 0x4f4   : > { %v888_v27 = vpop.xlane.xlu2 %887 }
 0x4f5   : > { %v896_v28 = vsub.f32 %v879_v56, %v888_v27 }
 0x4f6   : > { %v2863_v29 = vpop.f32.mrf.mxu0 }
 0x4f7   : > { %v2865_v30 = vpop.eup %2325  ;;  %v901_v31 = vmul.f32 1.442695, %v896_v28  ;;  %v1119_v32 = vpack.c.bf16 %v2863_v29, %v2861_v25 }
 0x4f8   : > { %v907_v35 = vsel %vm882_vm13, %v2865_v30, 0.0 }
 0x4f9   : > { %2327 = vpow2.f32 %v901_v31  ;;  %908 = vadd.xlane.f32.xlu2 %v907_v35 }
 0x4fc   : > { %v891_v36 = vpop.xlane.xlu1 %890 }
 0x4fd   : > { %v897_v38 = vsub.f32 %v880_v5, %v891_v36 }
 0x4fe   : > { %v2871_v39 = vpop.f32.mrf.mxu0 }
 0x4ff   : > { %v2873_v40 = vpop.eup %2327  ;;  %v903_v41 = vmul.f32 1.442695, %v897_v38 }
 0x500   : > { %v910_v42 = vsel %vm882_vm13, %v2873_v40, 0.0 }
 0x501   : > { %2329 = vpow2.f32 %v903_v41  ;;  %v1213_v45 = vpop.f32.mrf.mxu2  ;;  %911 = vadd.xlane.f32.xlu1 %v910_v42  ;;  %v2224_v42 = vld [vmem:[%s2501_s21 + $0x8] sm:$0xff] }
 0x502   : > { %1141 = vmatpush.bf16.msra.mxu1 %v2224_v42 }
 0x504   : > { %v894_v46 = vpop.xlane.xlu0 %893 }
 0x505   : > { %v898_v12 = vsub.f32 %v881_v11, %v894_v46 }
 0x506   : > { %v2877_v47 = vpop.f32.mrf.mxu0 }
 0x507   : > { %v2879_v0 = vpop.eup %2329  ;;  %v905_v48 = vmul.f32 1.442695, %v898_v12  ;;  %v1120_v8 = vpack.c.bf16 %v2877_v47, %v2871_v39 }
 0x508   : > { %v913_v4 = vsel %vm882_vm13, %v2879_v0, 0.0 }
 0x509   : > { %2331 = vpow2.f32 %v905_v48  ;;  %914 = vadd.xlane.f32.xlu1 %v913_v4  ;;  %v1215_v50 = vpop.f32.mrf.mxu2 }
 0x50e   : > { %v1252_v51 = vpop.f32.mrf.mxu0 }
 0x50f   : > { %v2885_v52 = vpop.eup %2331  ;;  %v1253_v53 = vadd.f32 %v1252_v51, %v1213_v45 }
 0x510   : > { %v916_v55 = vsel %vm882_vm13, %v2885_v52, 0.0 }
 0x511   : > { %917 = vadd.xlane.f32.xlu0 %v916_v55  ;;  %v1218_v33 = vpop.f32.mrf.mxu2  ;;  %v2890_v56 = vadd.f32 %v1253_v53, %v2759_v37 }
 0x513   : > { %v1266_v61 = vsel %vm882_vm13, %v2890_v56, -inf }
 0x516   : > { %v1254_v58 = vpop.f32.mrf.mxu0 }
 0x517   : > { %v1255_v60 = vadd.f32 %v1254_v58, %v1215_v50 }
 0x519   : > { %1267 = vmax.xlane.f32.xlu0 %v1266_v61  ;;  %v2895_v62 = vadd.f32 %v1255_v60, %v2766_v44  ;;  %v1220_v5 = vpop.f32.mrf.mxu2 }
 0x51b   : > { %v1269_v63 = vsel %vm882_vm13, %v2895_v62, -inf }
 0x51c   : > { %1270 = vmax.xlane.f32.xlu2 %v1269_v63 }
 0x51e   : > { %v1257_v1 = vpop.f32.mrf.mxu0 }
 0x51f   : > { %v1258_v2 = vadd.f32 %v1257_v1, %v1218_v33 }
 0x521   : > { %v2900_v3 = vadd.f32 %v1258_v2, %v2773_v49  ;;  %v1409_v11 = vpop.f32.mrf.mxu2 }
 0x523   : > { %v1272_v6 = vsel %vm882_vm13, %v2900_v3, -inf }
 0x524   : > { %1273 = vmax.xlane.f32.xlu2 %v1272_v6 }
 0x526   : > { %v1259_v7 = vpop.f32.mrf.mxu0 }
 0x527   : > { %v1260_v10 = vadd.f32 %v1259_v7, %v1220_v5 }
 0x529   : > { %v2905_v9 = vadd.f32 %v1260_v10, %v2780_v54  ;;  %v1411_v34 = vpop.f32.mrf.mxu2 }
 0x52b   : > { %v1275_v13 = vsel %vm882_vm13, %v2905_v9, -inf }
 0x52c   : > { %1276 = vmax.xlane.f32.xlu1 %v1275_v13 }
 0x52e   : > { %v1448_v14 = vpop.f32.mrf.mxu0 }
 0x52f   : > { %v1449_v15 = vadd.f32 %v1448_v14, %v1409_v11 }
 0x531   : > { %v2910_v16 = vadd.f32 %v1449_v15, %v2759_v37  ;;  %v1414_v22 = vpop.f32.mrf.mxu2 }
 0x533   : > { %v1462_v17 = vsel %vm882_vm13, %v2910_v16, -inf }
 0x534   : > { %1463 = vmax.xlane.f32.xlu0 %v1462_v17 }
 0x536   : > { %v1450_v18 = vpop.f32.mrf.mxu0 }
 0x537   : > { %v1451_v19 = vadd.f32 %v1450_v18, %v1411_v34 }
 0x539   : > { %v2915_v20 = vadd.f32 %v1451_v19, %v2766_v44  ;;  %v1416_v27 = vpop.f32.mrf.mxu2 }
 0x53b   : > { %v1465_v21 = vsel %vm882_vm13, %v2915_v20, -inf }
 0x53c   : > { %1466 = vmax.xlane.f32.xlu2 %v1465_v21 }
 0x53e   : > { %v1453_v23 = vpop.f32.mrf.mxu0 }
 0x53f   : > { %v1454_v24 = vadd.f32 %v1453_v23, %v1414_v22  ;;  %v2223_v23 = vld [vmem:[%s2501_s21] sm:$0xff] }
 0x540   : > { %1172 = vmatpush.bf16.msra.mxu3 %v2223_v23 }
 0x541   : > { %v2920_v37 = vadd.f32 %v1454_v24, %v2773_v49 }
 0x543   : > { %v1468_v26 = vsel %vm882_vm13, %v2920_v37, -inf }
 0x544   : > { %1469 = vmax.xlane.f32.xlu1 %v1468_v26 }
 0x546   : > { %v1455_v28 = vpop.f32.mrf.mxu0 }
 0x547   : > { %v1456_v31 = vadd.f32 %v1455_v28, %v1416_v27 }
 0x549   : > { %v2925_v44 = vadd.f32 %v1456_v31, %v2780_v54 }
 0x54b   : > { %v1471_v35 = vsel %vm882_vm13, %v2925_v44, -inf }
 0x54c   : > { %1472 = vmax.xlane.f32.xlu0 %v1471_v35 }
 0x554   : > { %1312 = vrot.lane.b32.xlu2 %v2682_v59, %s2416_s14 }
 0x560   : > { %1314 = vrot.lane.b32.xlu0 %v2677_v57, %s2416_s14 }
 0x56c   : > { %v909_v49 = vpop.xlane.xlu2 %908 }
 0x56d   : > { %2333 = vrcp.f32 %v909_v49 }
 0x573   : > { %v2334_v38 = vpop.eup %2333 }
 0x574   : > { %v912_v36 = vpop.xlane.xlu1 %911  ;;  %v923_v54 = vmul.f32 %v2334_v38, %v2865_v30 }
 0x575   : > { %2335 = vrcp.f32 %v912_v36 }
 0x57b   : > { %v2336_v41 = vpop.eup %2335 }
 0x57c   : > { %v924_v45 = vmul.f32 %v2336_v41, %v2873_v40  ;;  %v915_v12 = vpop.xlane.xlu1 %914 }
 0x57d   : > { %2337 = vrcp.f32 %v915_v12 }
 0x57e   : > { %v929_v46 = vpack.c.bf16 %v924_v45, %v923_v54 }
 0x580   : > { %2063 = vmatmul.msk.bf16.vlgmr.msrb.gmra.mxu1 %vm882_vm13, %v929_v46 }
 0x583   : > { %v2338_v4 = vpop.eup %2337 }
 0x584   : > { %v918_v48 = vpop.xlane.xlu0 %917  ;;  %v925_v53 = vmul.f32 %v2338_v4, %v2879_v0 }
 0x585   : > { %2339 = vrcp.f32 %v918_v48 }
 0x58b   : > { %v2340_v50 = vpop.eup %2339 }
 0x58c   : > { %v1268_v51 = vpop.xlane.xlu0 %1267  ;;  %v926_v55 = vmul.f32 %v2340_v50, %v2885_v52 }
 0x58d   : > { %v1278_v33 = vsub.f32 %v2890_v56, %v1268_v51 }
 0x58e   : > { %v930_v30 = vpack.c.bf16 %v926_v55, %v925_v53 }
 0x58f   : > { %v1282_v58 = vmul.f32 1.442695, %v1278_v33  ;;  %v1271_v40 = vpop.xlane.xlu2 %1270 }
 0x590   : > { %v1279_v60 = vsub.f32 %v2895_v62, %v1271_v40  ;;  %2064 = vmatmul.msk.bf16.gmra.mxu1 %vm882_vm13, %v930_v30 }
 0x591   : > { %2341 = vpow2.f32 %v1282_v58 }
 0x592   : > { %v1284_v61 = vmul.f32 1.442695, %v1279_v60 }
 0x594   : > { %2343 = vpow2.f32 %v1284_v61 }
 0x597   : > { %v2942_v63 = vpop.eup %2341  ;;  %v1274_v5 = vpop.xlane.xlu2 %1273 }
 0x598   : > { %v1280_v1 = vsub.f32 %v2900_v3, %v1274_v5  ;;  %v1290_v0 = vsel %vm882_vm13, %v2942_v63, 0.0 }
 0x599   : > { %1291 = vadd.xlane.f32.xlu2 %v1290_v0 }
 0x59a   : > { %v2947_v52 = vpop.eup %2343  ;;  %v1286_v56 = vmul.f32 1.442695, %v1280_v1 }
 0x59b   : > { %v1293_v62 = vsel %vm882_vm13, %v2947_v52, 0.0 }
 0x59c   : > { %2345 = vpow2.f32 %v1286_v56  ;;  %1294 = vadd.xlane.f32.xlu1 %v1293_v62 }
 0x59f   : > { %v1277_v2 = vpop.xlane.xlu1 %1276 }
 0x5a0   : > { %v1281_v6 = vsub.f32 %v2905_v9, %v1277_v2  ;;  %2075 = vmatmul.msk.bf16.vlgmr.msra.gmra.mxu1 %vm1127_vm14, %v1119_v32 }
 0x5a2   : > { %v2956_v3 = vpop.eup %2345  ;;  %v1288_v7 = vmul.f32 1.442695, %v1281_v6 }
 0x5a3   : > { %v1296_v10 = vsel %vm882_vm13, %v2956_v3, 0.0 }
 0x5a4   : > { %2347 = vpow2.f32 %v1288_v7  ;;  %1297 = vadd.xlane.f32.xlu1 %v1296_v10 }
 0x5a7   : > { %v1464_v11 = vpop.xlane.xlu0 %1463 }
 0x5a8   : > { %v1474_v13 = vsub.f32 %v2910_v16, %v1464_v11  ;;  %v2225_v11 = vld [vmem:[%s2501_s21 + $0x10] sm:$0xff] }
 0x5a9   : > { %1364 = vmatpush.bf16.msrb.mxu3 %v2225_v11  ;;  %v2232_v11 = vld [vmem:[%s2506_s24 + $0x24] sm:$0xf0] }
 0x5aa   : > { %v2961_v14 = vpop.eup %2347  ;;  %v1478_v15 = vmul.f32 1.442695, %v1474_v13 }
 0x5ab   : > { %v1299_v9 = vsel %vm882_vm13, %v2961_v14, 0.0 }
 0x5ac   : > { %2349 = vpow2.f32 %v1478_v15  ;;  %1300 = vadd.xlane.f32.xlu1 %v1299_v9 }
 0x5af   : > { %v1467_v25 = vpop.xlane.xlu2 %1466 }
 0x5b0   : > { %v1475_v29 = vsub.f32 %v2915_v20, %v1467_v25  ;;  %2076 = vmatmul.msk.bf16.gmra.mxu1 %vm1127_vm14, %v1120_v8 }
 0x5b1   : > { %1510 = vrot.lane.b32.xlu2 %v2677_v57, %s2419_s16 }
 0x5b2   : > { %v2972_v32 = vpop.eup %2349  ;;  %v1480_v16 = vmul.f32 1.442695, %v1475_v29 }
 0x5b3   : > { %v1486_v34 = vsel %vm882_vm13, %v2972_v32, 0.0 }
 0x5b4   : > { %2351 = vpow2.f32 %v1480_v16  ;;  %1487 = vadd.xlane.f32.xlu0 %v1486_v34 }
 0x5b7   : > { %v1470_v19 = vpop.xlane.xlu1 %1469  ;;  %v1313_v21 = vpop.permute.xlu2 %1312 }
 0x5b8   : > { %v1476_v39 = vsub.f32 %v2920_v37, %v1470_v19 }
 0x5ba   : > { %v2352_v17 = vpop.eup %2351  ;;  %v1482_v8 = vmul.f32 1.442695, %v1476_v39 }
 0x5bb   : > { %v1489_v18 = vsel %vm882_vm13, %v2352_v17, 0.0 }
 0x5bc   : > { %1490 = vadd.xlane.f32.xlu1 %v1489_v18  ;;  %2353 = vpow2.f32 %v1482_v8 }
 0x5bf   : > { %v1473_v47 = vpop.xlane.xlu0 %1472 }
 0x5c0   : > { %v1477_v24 = vsub.f32 %v2925_v44, %v1473_v47 }
 0x5c2   : > { %v2354_v20 = vpop.eup %2353  ;;  %v1484_v26 = vmul.f32 1.442695, %v1477_v24 }
 0x5c3   : > { %v1492_v22 = vsel %vm882_vm13, %v2354_v20, 0.0 }
 0x5c4   : > { %2355 = vpow2.f32 %v1484_v26 }
 0x5ca   : > { %v2356_v37 = vpop.eup %2355 }
 0x5cb   : > { %v1495_v28 = vsel %vm882_vm13, %v2356_v37, 0.0 }
 0x5d2   : > { %v1315_v57 = vpop.permute.xlu0 %1314 }
 0x5d3   : > { %1330 = vmatpush.bf16.msrb.mxu1 %v1315_v57 }
 0x5d5   : > { %1508 = vrot.lane.b32.xlu1 %v2682_v59, %s2419_s16 }
 0x5d7   : > { %1331 = vmatpush.bf16.msrb.mxu1 %v1313_v21 }
 0x5da   : > { %1493 = vadd.xlane.f32.xlu2 %v1492_v22 }
 0x5fd   : > { %v946_v27 = vpop.f32.mrf.mxu1 }
 0x5ff   : > { %1496 = vadd.xlane.f32.xlu1 %v1495_v28 }
 0x605   : > { %v948_v31 = vpop.f32.mrf.mxu1 }
 0x606   : > { %v956_v35 = vpack.c.bf16 %v948_v31, %v946_v27 }
 0x608   : > { %2081 = vmatmul.msk.bf16.vlgmr.msra.gmra.mxu3 %vm1127_vm14, %v956_v35 }
 0x60c   : > { %v1292_v59 = vpop.xlane.xlu2 %1291 }
 0x60d   : > { %v951_v49 = vpop.f32.mrf.mxu1  ;;  %2357 = vrcp.f32 %v1292_v59 }
 0x60f   : > { %v1295_v36 = vpop.xlane.xlu1 %1294 }
 0x610   : > { %2359 = vrcp.f32 %v1295_v36 }
 0x613   : > { %v2358_v38 = vpop.eup %2357 }
 0x614   : > { %v1511_v41 = vpop.permute.xlu2 %1510  ;;  %v1306_v45 = vmul.f32 %v2358_v38, %v2942_v63 }
 0x615   : > { %v953_v42 = vpop.f32.mrf.mxu1  ;;  %1526 = vmatpush.bf16.msra.mxu1 %v1511_v41  ;;  %v2381_v41 = vld [vmem:[%s3115_s9] sm:$0xff] }
 0x616   : > { %v2360_v44 = vpop.eup %2359  ;;  %v957_v54 = vpack.c.bf16 %v953_v42, %v951_v49 }
 0x617   : > { %v1307_v46 = vmul.f32 %v2360_v44, %v2947_v52  ;;  %v1298_v12 = vpop.xlane.xlu1 %1297 }
 0x618   : > { %2082 = vmatmul.msk.bf16.gmra.mxu3 %vm1127_vm14, %v957_v54  ;;  %2361 = vrcp.f32 %v1298_v12 }
 0x619   : > { %v1310_v48 = vpack.c.bf16 %v1307_v46, %v1306_v45 }
 0x61b   : > { %2087 = vmatmul.msk.bf16.vlgmr.msrb.gmra.mxu1 %vm882_vm13, %v1310_v48 }
 0x61d   : > { %v1143_v52 = vpop.f32.mrf.mxu1 }
 0x61e   : > { %v2362_v50 = vpop.eup %2361 }
 0x61f   : > { %v1301_v4 = vpop.xlane.xlu1 %1300  ;;  %v1308_v53 = vmul.f32 %v2362_v50, %v2956_v3 }
 0x620   : > { %2363 = vrcp.f32 %v1301_v4  ;;  %v2382_v4 = vld [vmem:[%s3115_s9 + $0x8] sm:$0xff] }
 0x625   : > { %v1145_v7 = vpop.f32.mrf.mxu1 }
 0x626   : > { %v2364_v51 = vpop.eup %2363 }
 0x627   : > { %v1309_v55 = vmul.f32 %v2364_v51, %v2961_v14  ;;  %v1488_v58 = vpop.xlane.xlu0 %1487 }
 0x629   : > { %v1311_v33 = vpack.c.bf16 %v1309_v55, %v1308_v53 }
 0x62b   : > { %2088 = vmatmul.msk.bf16.gmra.mxu1 %vm882_vm13, %v1311_v33 }
 0x62d   : > { %v1148_v13 = vpop.f32.mrf.mxu1 }
 0x62f   : > { %v1491_v30 = vpop.xlane.xlu1 %1490 }
 0x630   : > { %2365 = vrcp.f32 %v1491_v30  ;;  %v2383_v30 = vld [vmem:[%s3115_s9 + $0x10] sm:$0xff] }
 0x631   : > { %2367 = vrcp.f32 %v1488_v58 }
 0x635   : > { %v1150_v14 = vpop.f32.mrf.mxu1 }
 0x636   : > { %v2366_v40 = vpop.eup %2365 }
 0x637   : > { %v2368_v60 = vpop.eup %2367  ;;  %v1503_v61 = vmul.f32 %v2366_v40, %v2352_v17 }
 0x638   : > { %v1502_v63 = vmul.f32 %v2368_v60, %v2972_v32  ;;  %v2226_v32 = vld [vmem:[%s2501_s21 + $0x18] sm:$0xff] }
 0x639   : > { %1560 = vmatpush.bf16.msra.mxu3 %v2226_v32  ;;  %v2229_v32 = vld [vmem:[%s2506_s24 + $0x14] sm:$0xf] }
 0x63a   : > { %v1506_v1 = vpack.c.bf16 %v1503_v61, %v1502_v63 }
 0x647   : > { %v1509_v5 = vpop.permute.xlu1 %1508 }
 0x648   : > { %1527 = vmatpush.bf16.msra.mxu1 %v1509_v5  ;;  %v2384_v5 = vld [vmem:[%s3115_s9 + $0x18] sm:$0xff] }
 0x64b   : > { %2099 = vmatmul.msk.bf16.vlgmr.msra.gmra.mxu1 %vm882_vm13, %v1506_v1 }
 0x64d   : > { %v1494_v0 = vpop.xlane.xlu2 %1493 }
 0x64e   : > { %2369 = vrcp.f32 %v1494_v0 }
 0x654   : > { %v2370_v62 = vpop.eup %2369 }
 0x655   : > { %v1504_v6 = vmul.f32 %v2370_v62, %v2354_v20  ;;  %v2234_v62 = vld [vmem:[%s2506_s24 + $0x34] sm:$0xf0] }
 0x672   : > { %v1497_v56 = vpop.xlane.xlu1 %1496 }
 0x673   : > { %2371 = vrcp.f32 %v1497_v56  ;;  %v2133_v56 = vld [vmem:[%s2506_s24 + $0x30] sm:$0xf] }
 0x679   : > { %v2372_v2 = vpop.eup %2371 }
 0x67a   : > { %v1505_v3 = vmul.f32 %v2372_v2, %v2356_v37  ;;  %v2233_v2 = vld [vmem:[%s2506_s24 + $0x34] sm:$0xf] }
 0x67c   : > { %v1507_v10 = vpack.c.bf16 %v1505_v3, %v1504_v6  ;;  %v2134_v6 = vor.u32 %v2234_v62, %v2133_v56  ;;  %v2135_v3 = vld [vmem:[%s2506_s24 + $0x38] sm:$0xf0] }
 0x67e   : > { %2100 = vmatmul.msk.bf16.gmra.mxu1 %vm882_vm13, %v1507_v10  ;;  %1700 = vmatpush.bf16.msra.mxu2 %v2134_v6  ;;  %v2125_v10 = vld [vmem:[%s2506_s24 + $0x20] sm:$0xf] }
 0x68b   : > { %v1174_v47 = vpop.f32.mrf.mxu3 }
 0x68c   : > { %v1175_v59 = vadd.f32 %v1174_v47, %v1143_v52 }
 0x693   : > { %v1176_v20 = vpop.f32.mrf.mxu3 }
 0x694   : > { %v1177_v44 = vadd.f32 %v1176_v20, %v1145_v7  ;;  %v2138_v7 = vor.u32 %v2233_v2, %v2135_v3  ;;  %v2247_v2 = vld [vmem:[%s2511_s28 + $0x60] sm:$0xff] }
 0x696   : > { %1719 = vmatpush.bf16.msrb.mxu0 %v2138_v7 }
 0x698   : > { %v1333_v15 = vpop.f32.mrf.mxu1 }
 0x69b   : > { %v1179_v21 = vpop.f32.mrf.mxu3 }
 0x69c   : > { %v1180_v26 = vadd.f32 %v1179_v21, %v1148_v13  ;;  %v2231_v13 = vld [vmem:[%s2506_s24 + $0x24] sm:$0xf] }
 0x6a0   : > { %v1335_v9 = vpop.f32.mrf.mxu1 }
 0x6a1   : > { %v1343_v25 = vpack.c.bf16 %v1335_v9, %v1333_v15  ;;  %v2127_v15 = vld [vmem:[%s2506_s24 + $0x28] sm:$0xf0] }
 0x6a2   : > { %v2130_v9 = vor.u32 %v2231_v13, %v2127_v15 }
 0x6a3   : > { %2093 = vmatmul.msk.bf16.vlgmr.msrb.gmra.mxu3 %vm1127_vm14, %v1343_v25  ;;  %v1181_v22 = vpop.f32.mrf.mxu3  ;;  %v2117_v25 = vld [vmem:[%s2506_s24 + $0x10] sm:$0xf] }
 0x6a4   : > { %v1182_v28 = vadd.f32 %v1181_v22, %v1150_v14  ;;  %v2126_v14 = vor.u32 %v2232_v11, %v2125_v10  ;;  %1720 = vmatpush.bf16.msrb.mxu0 %v2130_v9 }
 0x6a6   : > { %1701 = vmatpush.bf16.msra.mxu2 %v2126_v14 }
 0x6a8   : > { %v1338_v29 = vpop.f32.mrf.mxu1 }
 0x6b0   : > { %v1340_v16 = vpop.f32.mrf.mxu1 }
 0x6b1   : > { %v1344_v34 = vpack.c.bf16 %v1340_v16, %v1338_v29  ;;  %v2230_v29 = vld [vmem:[%s2506_s24 + $0x14] sm:$0xf0] }
 0x6b2   : > { %v2118_v16 = vor.u32 %v2230_v29, %v2117_v25 }
 0x6b3   : > { %2094 = vmatmul.msk.bf16.gmra.mxu3 %vm1127_vm14, %v1344_v34  ;;  %v2119_v34 = vld [vmem:[%s2506_s24 + $0x18] sm:$0xf0] }
 0x6b4   : > { %1702 = vmatpush.bf16.msra.mxu2 %v2118_v16 }
 0x6c8   : > { %v1529_v17 = vpop.f32.mrf.mxu1 }
 0x6d0   : > { %v1531_v18 = vpop.f32.mrf.mxu1 }
 0x6d1   : > { %v1539_v19 = vpack.c.bf16 %v1531_v18, %v1529_v17  ;;  %v2122_v17 = vor.u32 %v2229_v32, %v2119_v34  ;;  %v2109_v18 = vld [vmem:[%s2506_s24] sm:$0xf] }
 0x6d3   : > { %2105 = vmatmul.msk.bf16.vlgmr.msra.gmra.mxu3 %vm1127_vm14, %v1539_v19  ;;  %1721 = vmatpush.bf16.msrb.mxu0 %v2122_v17  ;;  %v2228_v19 = vld [vmem:[%s2506_s24 + $0x4] sm:$0xf0]  ;;  %v2246_v17 = vld [vmem:[%s2511_s28 + $0x58] sm:$0xff] }
 0x6d4   : > { %v2110_v47 = vor.u32 %v2228_v19, %v2109_v18  ;;  %v2239_v18 = vld [vmem:[%s2511_s28 + $0x20] sm:$0xff]  ;;  %v2245_v19 = vld [vmem:[%s2511_s28 + $0x50] sm:$0xff] }
 0x6d6   : > { %1703 = vmatpush.bf16.msra.mxu2 %v2110_v47  ;;  %v2244_v47 = vld [vmem:[%s2511_s28 + $0x48] sm:$0xff] }
 0x6fb   : > { %v1534_v39 = vpop.f32.mrf.mxu1 }
 0x703   : > { %v1536_v8 = vpop.f32.mrf.mxu1 }
 0x704   : > { %v1540_v57 = vpack.c.bf16 %v1536_v8, %v1534_v39  ;;  %v2227_v39 = vld [vmem:[%s2506_s24 + $0x4] sm:$0xf]  ;;  %v2111_v8 = vld [vmem:[%s2506_s24 + $0x8] sm:$0xf0] }
 0x706   : > { %2106 = vmatmul.msk.bf16.gmra.mxu3 %vm1127_vm14, %v1540_v57  ;;  %v2114_v57 = vor.u32 %v2227_v39, %v2111_v8  ;;  %v2238_v39 = vld [vmem:[%s2511_s28 + $0x18] sm:$0xff]  ;;  %v2237_v8 = vld [vmem:[%s2511_s28 + $0x10] sm:$0xff] }
 0x708   : > { %1722 = vmatpush.bf16.msrb.mxu0 %v2114_v57  ;;  %v2243_v57 = vld [vmem:[%s2511_s28 + $0x40] sm:$0xff] }
 0x726   : > { %v1366_v23 = vpop.f32.mrf.mxu3 }
 0x727   : > { %v1376_v49 = vadd.f32 %v1366_v23, %v1175_v59 }
 0x72e   : > { %v1368_v24 = vpop.f32.mrf.mxu3 }
 0x72f   : > { %v1377_v45 = vadd.f32 %v1368_v24, %v1177_v44 }
 0x736   : > { %v1371_v37 = vpop.f32.mrf.mxu3 }
 0x737   : > { %v1378_v27 = vadd.f32 %v1371_v37, %v1180_v26 }
 0x73e   : > { %v1373_v31 = vpop.f32.mrf.mxu3 }
 0x73f   : > { %v1379_v35 = vadd.f32 %v1373_v31, %v1182_v28 }
 0x756   : > { %v1562_v36 = vpop.f32.mrf.mxu3 }
 0x757   : > { %v1572_v38 = vadd.f32 %v1562_v36, %v1376_v49 }
 0x759   : > { %v3004_v42 = vadd.f32 %v2381_v41, %v1572_v38 }
 0x75b   : > { %v1580_v54 = vmul.f32 %v3004_v42, %v3004_v42 }
 0x75d   : > { %v1584_v46 = vsel %vm534_vm1, %v1580_v54, 0.0 }
 0x75e   : > { %1585 = vadd.xlane.f32.xlu0 %v1584_v46  ;;  %v1564_v12 = vpop.f32.mrf.mxu3 }
 0x75f   : > { %v1573_v48 = vadd.f32 %v1564_v12, %v1377_v45 }
 0x761   : > { %v3012_v50 = vadd.f32 %v2382_v4, %v1573_v48 }
 0x763   : > { %v1581_v51 = vmul.f32 %v3012_v50, %v3012_v50 }
 0x765   : > { %v1587_v53 = vsel %vm534_vm1, %v1581_v51, 0.0 }
 0x766   : > { %1588 = vadd.xlane.f32.xlu0 %v1587_v53 }
 0x789   : > { %v1567_v55 = vpop.f32.mrf.mxu3 }
 0x78a   : > { %v1574_v33 = vadd.f32 %v1567_v55, %v1378_v27 }
 0x78c   : > { %v3020_v58 = vadd.f32 %v2383_v30, %v1574_v33  ;;  %v2250_v33 = vld [vmem:[%s2511_s28 + $0x78] sm:$0xff] }
 0x78d   : > { %v2242_v30 = vld [vmem:[%s2511_s28 + $0x38] sm:$0xff]  ;;  %1869 = vmatpush.bf16.msrb.mxu3 %v2250_v33 }
 0x78e   : > { %v1582_v40 = vmul.f32 %v3020_v58, %v3020_v58  ;;  %1850 = vmatpush.bf16.msrb.mxu1 %v2242_v30 }
 0x790   : > { %v1590_v60 = vsel %vm534_vm1, %v1582_v40, 0.0  ;;  %v2249_v40 = vld [vmem:[%s2511_s28 + $0x70] sm:$0xff] }
 0x791   : > { %1591 = vadd.xlane.f32.xlu2 %v1590_v60  ;;  %v1569_v61 = vpop.f32.mrf.mxu3  ;;  %v2241_v60 = vld [vmem:[%s2511_s28 + $0x30] sm:$0xff]  ;;  %1870 = vmatpush.bf16.msrb.mxu3 %v2249_v40 }
 0x792   : > { %v1575_v63 = vadd.f32 %v1569_v61, %v1379_v35  ;;  %1851 = vmatpush.bf16.msrb.mxu1 %v2241_v60 }
 0x794   : > { %v3028_v1 = vadd.f32 %v2384_v5, %v1575_v63  ;;  %v2248_v5 = vld [vmem:[%s2511_s28 + $0x68] sm:$0xff] }
 0x795   : > { %1871 = vmatpush.bf16.msrb.mxu3 %v2248_v5 }
 0x796   : > { %v1583_v0 = vmul.f32 %v3028_v1, %v3028_v1 }
 0x798   : > { %v1593_v52 = vsel %vm534_vm1, %v1583_v0, 0.0  ;;  %v2240_v0 = vld [vmem:[%s2511_s28 + $0x28] sm:$0xff] }
 0x799   : > { %1594 = vadd.xlane.f32.xlu0 %v1593_v52  ;;  %1852 = vmatpush.bf16.msrb.mxu1 %v2240_v0 }
 0x79a   : > { %1872 = vmatpush.bf16.msrb.mxu3 %v2247_v2 }
 0x79d   : > { %1853 = vmatpush.bf16.msrb.mxu1 %v2239_v18 }
 0x79e   : > { %1873 = vmatpush.bf16.msrb.mxu3 %v2246_v17 }
 0x7a1   : > { %1854 = vmatpush.bf16.msrb.mxu1 %v2238_v39 }
 0x7a2   : > { %1874 = vmatpush.bf16.msrb.mxu3 %v2245_v19 }
 0x7a5   : > { %1855 = vmatpush.bf16.msrb.mxu1 %v2237_v8 }
 0x7a6   : > { %1875 = vmatpush.bf16.msrb.mxu3 %v2244_v47 }
 0x7aa   : > { %1876 = vmatpush.bf16.msrb.mxu3 %v2243_v57 }
 0x7d1   : > { %v1586_v20 = vpop.xlane.xlu0 %1585 }
 0x7d2   : > { %v1596_v21 = vmul.f32 %v1586_v20, %v2584_v43  ;;  %v2236_v20 = vld [vmem:[%s2511_s28 + $0x8] sm:$0xff] }
 0x7d3   : > { %1856 = vmatpush.bf16.msrb.mxu1 %v2236_v20 }
 0x7d4   : > { %v1600_v22 = vadd.f32 1.1920929e-07, %v1596_v21  ;;  %v2235_v21 = vld [vmem:[%s2511_s28] sm:$0xff] }
 0x7d6   : > { %2373 = vrsqrt.f32 %v1600_v22  ;;  %vm1610_vm0 = vweird.f32 %v1600_v22 }
 0x7d7   : > { %1857 = vmatpush.bf16.msrb.mxu1 %v2235_v21 }
 0x7d9   : > { %v1589_v23 = vpop.xlane.xlu0 %1588 }
 0x7da   : > { %v1597_v24 = vmul.f32 %v1589_v23, %v2584_v43 }
 0x7dc   : > { %v2374_v26 = vpop.eup %2373  ;;  %v1601_v37 = vadd.f32 1.1920929e-07, %v1597_v24 }
 0x7dd   : > { %v1605_v27 = vmul.f32 %v2374_v26, %v1600_v22  ;;  %vm1611_vm15 = vweird.f32 %v2374_v26 }
 0x7de   : > { %2375 = vrsqrt.f32 %v1601_v37  ;;  %vm1612_vm3 = vmor %vm1610_vm0, %vm1611_vm15  ;;  %vm1620_vm4 = vweird.f32 %v1601_v37 }
 0x7df   : > { %v1606_v28 = vmul.f32 %v2374_v26, %v1605_v27 }
 0x7e1   : > { %v1607_v31 = vmul.f32 0.5, %v1606_v28 }
 0x7e3   : > { %v1608_v59 = vsub.f32 1.5, %v1607_v31 }
 0x7e4   : > { %v2376_v35 = vpop.eup %2375 }
 0x7e5   : > { %v1615_v49 = vmul.f32 %v2376_v35, %v1601_v37  ;;  %v1609_v38 = vmul.f32 %v2374_v26, %v1608_v59  ;;  %vm1621_vm2 = vweird.f32 %v2376_v35 }
 0x7e6   : > { %vm1622_vm5 = vmor %vm1620_vm4, %vm1621_vm2 }
 0x7e7   : > { %v1616_v36 = vmul.f32 %v2376_v35, %v1615_v49  ;;  %v1613_v54 = vsel %vm1612_vm3, %v2374_v26, %v1609_v38 }
 0x7e8   : > { %v1644_v12 = vmul.f32 %v1613_v54, %v3004_v42 }
 0x7e9   : > { %v1617_v41 = vmul.f32 0.5, %v1616_v36 }
 0x7eb   : > { %v1618_v44 = vsub.f32 1.5, %v1617_v41 }
 0x7ed   : > { %v1619_v45 = vmul.f32 %v2376_v35, %v1618_v44 }
 0x7ef   : > { %v1623_v46 = vsel %vm1622_vm5, %v2376_v35, %v1619_v45 }
 0x7f0   : > { %v1645_v48 = vmul.f32 %v1623_v46, %v3012_v50 }
 0x7f2   : > { %v1648_v4 = vpack.c.bf16 %v1645_v48, %v1644_v12 }
 0x7f4   : > { %2139 = vmatmul.msk.bf16.vlgmr.msra.gmra.mxu2 %vm534_vm1, %v1648_v4  ;;  %2141 = vmatmul.msk.bf16.vlgmr.msrb.gmra.mxu0 %vm534_vm1, %v1648_v4 }
 0x804   : > { %v1592_v51 = vpop.xlane.xlu2 %1591 }
 0x805   : > { %v1598_v53 = vmul.f32 %v1592_v51, %v2584_v43 }
 0x807   : > { %v1602_v55 = vadd.f32 1.1920929e-07, %v1598_v53 }
 0x809   : > { %2377 = vrsqrt.f32 %v1602_v55  ;;  %vm1630_vm7 = vweird.f32 %v1602_v55 }
 0x80c   : > { %v1595_v61 = vpop.xlane.xlu0 %1594 }
 0x80d   : > { %v1599_v63 = vmul.f32 %v1595_v61, %v2584_v43 }
 0x80f   : > { %v2378_v52 = vpop.eup %2377  ;;  %v1603_v56 = vadd.f32 1.1920929e-07, %v1599_v63 }
 0x810   : > { %v1625_v62 = vmul.f32 %v2378_v52, %v1602_v55  ;;  %vm1631_vm6 = vweird.f32 %v2378_v52 }
 0x811   : > { %2379 = vrsqrt.f32 %v1603_v56  ;;  %vm1632_vm9 = vmor %vm1630_vm7, %vm1631_vm6  ;;  %vm1640_vm10 = vweird.f32 %v1603_v56 }
 0x812   : > { %v1626_v6 = vmul.f32 %v2378_v52, %v1625_v62 }
 0x814   : > { %v1627_v3 = vmul.f32 0.5, %v1626_v6 }
 0x816   : > { %v1628_v10 = vsub.f32 1.5, %v1627_v3 }
 0x817   : > { %v2380_v7 = vpop.eup %2379 }
 0x818   : > { %v1635_v11 = vmul.f32 %v2380_v7, %v1603_v56  ;;  %v1629_v14 = vmul.f32 %v2378_v52, %v1628_v10  ;;  %vm1641_vm8 = vweird.f32 %v2380_v7 }
 0x819   : > { %vm1642_vm11 = vmor %vm1640_vm10, %vm1641_vm8 }
 0x81a   : > { %v1636_v13 = vmul.f32 %v2380_v7, %v1635_v11  ;;  %v1633_v25 = vsel %vm1632_vm9, %v2378_v52, %v1629_v14 }
 0x81b   : > { %v1646_v32 = vmul.f32 %v1633_v25, %v3020_v58 }
 0x81c   : > { %v1637_v43 = vmul.f32 0.5, %v1636_v13 }
 0x81e   : > { %v1638_v15 = vsub.f32 1.5, %v1637_v43 }
 0x820   : > { %v1639_v9 = vmul.f32 %v2380_v7, %v1638_v15 }
 0x822   : > { %v1643_v29 = vsel %vm1642_vm11, %v2380_v7, %v1639_v9 }
 0x823   : > { %v1647_v16 = vmul.f32 %v1643_v29, %v3028_v1 }
 0x825   : > { %v1649_v34 = vpack.c.bf16 %v1647_v16, %v1646_v32 }
 0x827   : > { %2140 = vmatmul.msk.bf16.gmra.mxu2 %vm534_vm1, %v1649_v34  ;;  %2142 = vmatmul.msk.bf16.gmra.mxu0 %vm534_vm1, %v1649_v34 }
 0x871   : > { %v1724_v22 = vpop.f32.mrf.mxu0 }
 0x872   : > { %v1735_v24 = vmax.f32 %v1724_v22, 0.0 }
 0x874   : > { %v1743_v27 = vmul.f32 %v1735_v24, %v1735_v24 }
 0x877   : > { %v1705_v23 = vpop.f32.mrf.mxu2 }
 0x878   : > { %v1734_v31 = vmax.f32 %v1705_v23, 0.0 }
 0x879   : > { %v1726_v26 = vpop.f32.mrf.mxu0 }
 0x87a   : > { %v1737_v37 = vmax.f32 %v1726_v26, 0.0  ;;  %v1742_v36 = vmul.f32 %v1734_v31, %v1734_v31 }
 0x87c   : > { %v1745_v28 = vmul.f32 %v1737_v37, %v1737_v37 }
 0x87e   : > { %v1751_v35 = vpack.c.bf16 %v1745_v28, %v1743_v27 }
 0x87f   : > { %v1707_v59 = vpop.f32.mrf.mxu2 }
 0x880   : > { %v1736_v49 = vmax.f32 %v1707_v59, 0.0  ;;  %1877 = vmatmul.bf16.vlgmr.msrb.gmra.mxu3 %v1751_v35 }
 0x882   : > { %v1744_v38 = vmul.f32 %v1736_v49, %v1736_v49 }
 0x884   : > { %v1750_v41 = vpack.c.bf16 %v1744_v38, %v1742_v36 }
 0x886   : > { %1858 = vmatmul.bf16.vlgmr.msrb.gmra.mxu1 %v1750_v41 }
 0x8a4   : > { %v1729_v44 = vpop.f32.mrf.mxu0 }
 0x8a5   : > { %v1739_v45 = vmax.f32 %v1729_v44, 0.0 }
 0x8a7   : > { %v1747_v48 = vmul.f32 %v1739_v45, %v1739_v45 }
 0x8aa   : > { %v1710_v54 = vpop.f32.mrf.mxu2 }
 0x8ab   : > { %v1738_v51 = vmax.f32 %v1710_v54, 0.0 }
 0x8ac   : > { %v1731_v46 = vpop.f32.mrf.mxu0 }
 0x8ad   : > { %v1741_v12 = vmax.f32 %v1731_v46, 0.0  ;;  %v1746_v30 = vmul.f32 %v1738_v51, %v1738_v51 }
 0x8af   : > { %v1749_v4 = vmul.f32 %v1741_v12, %v1741_v12 }
 0x8b1   : > { %v1753_v53 = vpack.c.bf16 %v1749_v4, %v1747_v48 }
 0x8b2   : > { %v1712_v55 = vpop.f32.mrf.mxu2 }
 0x8b3   : > { %v1740_v33 = vmax.f32 %v1712_v55, 0.0  ;;  %1882 = vmatmul.bf16.gmra.mxu3 %v1753_v53 }
 0x8b5   : > { %v1748_v40 = vmul.f32 %v1740_v33, %v1740_v33 }
 0x8b7   : > { %v1752_v60 = vpack.c.bf16 %v1748_v40, %v1746_v30 }
 0x8b9   : > { %1863 = vmatmul.bf16.gmra.mxu1 %v1752_v60 }
 0x903   : > { %v1859_v61 = vpop.f32.mrf.mxu1  ;;  %v1878_v63 = vpop.f32.mrf.mxu3 }
 0x904   : > { %v1879_v5 = vadd.f32 %v1878_v63, %v1859_v61 }
 0x906   : > { %v1888_v0 = vadd.f32 %v1879_v5, %v3004_v42 }
 0x908   : > { %1892 = vst.msk [vmem:[%s3115_s9] sm:$0xff] %vm534_vm1, %v1888_v0 }
 0x90b   : > { %v1861_v52 = vpop.f32.mrf.mxu1  ;;  %v1880_v56 = vpop.f32.mrf.mxu3 }
 0x90c   : > { %v1881_v62 = vadd.f32 %v1880_v56, %v1861_v52 }
 0x90e   : > { %v1889_v2 = vadd.f32 %v1881_v62, %v3012_v50 }
 0x910   : > { %1893 = vst.msk [vmem:[%s3115_s9 + $0x8] sm:$0xff] %vm534_vm1, %v1889_v2 }
 0x936   : > { %v1864_v6 = vpop.f32.mrf.mxu1  ;;  %v1883_v3 = vpop.f32.mrf.mxu3 }
 0x937   : > { %v1884_v7 = vadd.f32 %v1883_v3, %v1864_v6 }
 0x939   : > { %v1890_v42 = vadd.f32 %v1884_v7, %v3020_v58 }
 0x93b   : > { %1894 = vst.msk [vmem:[%s3115_s9 + $0x10] sm:$0xff] %vm534_vm1, %v1890_v42 }
 0x93e   : > { %v1866_v10 = vpop.f32.mrf.mxu1  ;;  %v1885_v11 = vpop.f32.mrf.mxu3 }
 0x93f   : > { %v1886_v13 = vadd.f32 %v1885_v11, %v1866_v10 }
 0x941   : > { %v1891_v50 = vadd.f32 %v1886_v13, %v3028_v1 }
 0x943   : > { %1895 = vst.msk [vmem:[%s3115_s9 + $0x18] sm:$0xff] %vm534_vm1, %v1891_v50 }
 0x944 PF: > { %s19_s11 = sadd.s32 1, %s2407_s11   ;;  %s3116_s30 = smov %s2403_s10 }
 0x945   : > { %p16_p6 = scmp.ge.s32.totalorder %s19_s11, 4   ;;  %s3117_s10 = smov %s3119_s12 }
 0x947   :  { %18 = sbr.rel (!%p16_p6) target bundleno = 2 (0x2), region = 102 }

</bundles_post_ra>
